<compile_context>
chip_gen: v5e
topology: v5e:2x2
jax: 0.10.0
libtpu: 0.0.40
codegen_flags: <defaults>
</compile_context>

<pallas_src>
import functools

import jax
import jax.numpy as jnp
from jax import lax
from jax.experimental import pallas as pl
from jax.experimental.pallas import tpu as pltpu


def _round_up(v, m):
    return (v + m - 1) // m * m


def _vmem_capacity_bytes():
    # 128 MiB on v5e/v6e, 64 MiB per TensorCore on v7x.
    try:
        return int(pltpu.get_tpu_info().vmem_capacity_bytes)
    except Exception:
        return 64 << 20  # conservative fallback


def _vmem_limit(footprint_bytes, cap_bytes):
    want = max(32 << 20, int(1.5 * footprint_bytes) + (8 << 20))
    return int(min(want, int(0.85 * cap_bytes)))


def _pick_tile_m(n, c_pad, cap_bytes):
    """Largest row tile whose double-buffered int8 adj stream + resident scratch fits."""
    budget = int(0.70 * cap_bytes)
    n_lane = _round_up(max(n, 1), 128)
    for tm in (512, 256, 128):
        tm = min(tm, n_lane)
        n_pad = _round_up(n, tm)
        resident = 2 * n_pad * c_pad * 2 + n_pad * c_pad * 4       # H ping-pong + acc
        streamed = 2 * tm * n_pad * 1 + 2 * tm * (c_pad + 1) * 4   # adj int8 + out + scale
        if resident + streamed + (4 << 20) <= budget:
            return tm
    return min(128, n_lane)


# ---------------------------------------------------------------------------
# graph glue (plain JAX): dense symmetric GCN normalization of A + I
# TODO(synk): for genuinely large sparse graphs this dense O(N^2) A_hat should
# be replaced by a scalar-prefetch neighbor-list gather kernel.
# ---------------------------------------------------------------------------
def _build_norm_adj(edge_index, n):
    src, dst = edge_index[0], edge_index[1]
    a = jnp.zeros((n, n), jnp.float32).at[dst, src].add(1.0)  # duplicates accumulate
    a = a + jnp.eye(n, dtype=jnp.float32)                     # self loops
    deg = jnp.sum(a, axis=1)
    d_inv_sqrt = jnp.where(deg > 0, lax.rsqrt(deg), 0.0)
    return d_inv_sqrt[:, None] * a * d_inv_sqrt[None, :]


# ---------------------------------------------------------------------------
# Kernel 1: MLP   H0 = relu(X @ W1 + b1) @ W2 + b2   (bf16 MXU, f32 accumulate)
# ---------------------------------------------------------------------------
def _mlp_kernel(x_ref, w1_ref, b1_ref, w2_ref, b2_ref, h0_ref):
    h = jnp.dot(x_ref[...], w1_ref[...], preferred_element_type=jnp.float32)
    h = jnp.maximum(h + b1_ref[...], 0.0)
    h0 = jnp.dot(h.astype(jnp.bfloat16), w2_ref[...],
                 preferred_element_type=jnp.float32)
    h0_ref[...] = (h0 + b2_ref[...]).astype(h0_ref.dtype)


# ---------------------------------------------------------------------------
# Kernel 2: K-step propagation + gated accumulation + masked log_softmax
# grid = (k_steps, num_row_blocks); k outer (sequential), row blocks inner.
# ---------------------------------------------------------------------------
def _make_prop_kernel(*, tm, n_classes, k_steps):
    def kernel(h0_hbm, adj_ref, scale_ref, pw_ref, pb_ref, out_ref,
               h_pp, acc_ref, dma_sem):
        k = pl.program_id(0)
        i = pl.program_id(1)
        row0 = pl.multiple_of(i * tm, tm)
        rows = pl.ds(row0, tm)

        read_slot = lax.rem(k, 2)          # parity ping-pong: read k%2
        write_slot = 1 - read_slot         # write (k+1)%2

        pw_row = pw_ref[...]               # (1, C_pad) f32 — hoisted, used twice
        pb = pb_ref[0, 0]                  # scalar bias from SMEM

        # one-time: DMA the full bf16 H0 from HBM into ping-pong slot 0.
        @pl.when((k == 0) & (i == 0))
        def _():
            cp = pltpu.make_async_copy(h0_hbm, h_pp.at[0], dma_sem.at[0])
            cp.start()
            cp.wait()

        # k == 0: initialize accumulator rows with the gated H0 contribution.
        @pl.when(k == 0)
        def _():
            h0r = h_pp[0, rows, :].astype(jnp.float32)
            s0 = jax.nn.sigmoid(
                jnp.sum(h0r * pw_row, axis=1, keepdims=True) + pb)
            acc_ref[rows, :] = s0 * h0r

        # H_{k+1}[rows] = dequant(A_hat_int8[rows, :]) @ H_k   (bf16 MXU, f32 acc)
        adj_bf = adj_ref[...].astype(jnp.bfloat16)        # int8 -> bf16 on the VPU
        new = jnp.dot(adj_bf, h_pp[read_slot],
                      preferred_element_type=jnp.float32)  # (TM, C_pad) f32
        new = new * scale_ref[...]                         # fold per-row int8 scale back

        # retain score via VPU multiply + lane reduction (no 1-lane MXU matmul)
        s = jax.nn.sigmoid(jnp.sum(new * pw_row, axis=1, keepdims=True) + pb)
        acc_ref[rows, :] = acc_ref[rows, :] + s * new

        # stash H_{k+1} for the next pass (skipped on the final k — dead store)
        @pl.when(k < k_steps - 1)
        def _():
            h_pp[write_slot, rows, :] = new.astype(h_pp.dtype)

        # last step: masked log_softmax over the real classes, lane-dense out.
        # NOTE: out blocks for k < last are written back untouched (garbage) and
        # overwritten on the final pass — do not alias/inspect mid-flight.
        @pl.when(k == k_steps - 1)
        def _():
            a = acc_ref[rows, :]
            col = lax.broadcasted_iota(jnp.int32, a.shape, 1)
            valid = col < n_classes
            m = jnp.max(jnp.where(valid, a, -1e30), axis=1, keepdims=True)
            z = a - m
            e = jnp.where(valid, jnp.exp(z), 0.0)
            lse = jnp.log(jnp.sum(e, axis=1, keepdims=True))
            out_ref[...] = z - lse

    return kernel


# ---------------------------------------------------------------------------
# wrapper
# ---------------------------------------------------------------------------
def dagnn_forward(x, edge_index, params, *, k_steps, tile_m=None):
    """x: [N, F] f32, edge_index: [2, E] int32. Returns [N, classes] log-probs."""
    assert k_steps >= 1
    w1, b1, w2, b2, pw, pb = params
    n, f = x.shape
    hidden = w1.shape[1]
    classes = w2.shape[1]

    f_pad = _round_up(f, 128)
    h_pad = _round_up(hidden, 128)
    c_pad = _round_up(classes, 128)

    cap = _vmem_capacity_bytes()
    tm = _pick_tile_m(n, c_pad, cap) if tile_m is None else int(tile_m)
    n_pad = _round_up(n, tm)
    nb = n_pad // tm

    def pad2(arr, r, c):
        return jnp.zeros((r, c), jnp.float32).at[:arr.shape[0], :arr.shape[1]].set(arr)

    # --- normalized adjacency, per-row int8 quantization ---------------------
    a_hat = pad2(_build_norm_adj(edge_index, n), n_pad, n_pad)
    row_max = jnp.max(a_hat, axis=1, keepdims=True)
    inv = jnp.where(row_max > 0, 127.0 / row_max, 0.0)
    adj_q = jnp.clip(jnp.round(a_hat * inv), -127.0, 127.0).astype(jnp.int8)
    adj_scale = (row_max / 127.0).astype(jnp.float32)            # (n_pad, 1)

    # --- padded, lane-dense operands (bf16 where they feed the MXU) ---------
    x_p = pad2(x, n_pad, f_pad).astype(jnp.bfloat16)
    w1_p = pad2(w1, f_pad, h_pad).astype(jnp.bfloat16)
    b1_p = pad2(b1.reshape(1, -1), 1, h_pad)
    w2_p = pad2(w2, h_pad, c_pad).astype(jnp.bfloat16)
    b2_p = pad2(b2.reshape(1, -1), 1, c_pad)
    pw_p = pad2(pw.reshape(1, -1), 1, c_pad)                     # (C,1) -> lane-dense row
    pb_p = jnp.asarray(pb, jnp.float32).reshape(1, 1)

    # --- phase 1: MLP (row-tiled, row-parallel) -----------------------------
    mlp_fp = (2 * tm * f_pad * 2 + 2 * f_pad * h_pad * 2 + 2 * h_pad * c_pad * 2
              + 2 * tm * c_pad * 2 + tm * (h_pad + c_pad) * 4
              + 2 * (h_pad + c_pad) * 4)
    h0 = pl.pallas_call(
        _mlp_kernel,
        out_shape=jax.ShapeDtypeStruct((n_pad, c_pad), jnp.bfloat16),
        grid=(nb,),
        in_specs=[
            pl.BlockSpec((tm, f_pad), lambda i: (i, 0)),
            pl.BlockSpec((f_pad, h_pad), lambda i: (0, 0)),
            pl.BlockSpec((1, h_pad), lambda i: (0, 0)),
            pl.BlockSpec((h_pad, c_pad), lambda i: (0, 0)),
            pl.BlockSpec((1, c_pad), lambda i: (0, 0)),
        ],
        out_specs=pl.BlockSpec((tm, c_pad), lambda i: (i, 0)),
        compiler_params=pltpu.CompilerParams(
            dimension_semantics=("parallel",),
            vmem_limit_bytes=_vmem_limit(mlp_fp, cap),
        ),
    )(x_p, w1_p, b1_p, w2_p, b2_p)

    # --- phase 2: propagation + gating + log_softmax ------------------------
    prop_fp = (2 * n_pad * c_pad * 2      # H ping-pong scratch (bf16)
               + n_pad * c_pad * 4        # accumulator scratch (f32)
               + 2 * tm * n_pad * 1       # int8 adj tiles (double-buffered)
               + 2 * tm * (c_pad + 1) * 4 # out tiles + row scales
               + 2 * c_pad * 4 + 64)
    prop_kernel = _make_prop_kernel(tm=tm, n_classes=classes, k_steps=k_steps)
    out_p = pl.pallas_call(
        prop_kernel,
        out_shape=jax.ShapeDtypeStruct((n_pad, c_pad), jnp.float32),
        grid=(k_steps, nb),
        in_specs=[
            pl.BlockSpec(memory_space=pl.ANY),                   # H0 stays in HBM
            pl.BlockSpec((tm, n_pad), lambda k, i: (i, 0)),      # int8 A_hat row tiles
            pl.BlockSpec((tm, 1), lambda k, i: (i, 0)),          # per-row dequant scale
            pl.BlockSpec((1, c_pad), lambda k, i: (0, 0)),       # proj weight row
            pl.BlockSpec(memory_space=pltpu.MemorySpace.SMEM),   # proj bias scalar
        ],
        out_specs=pl.BlockSpec((tm, c_pad), lambda k, i: (i, 0)),
        scratch_shapes=[
            pltpu.VMEM((2, n_pad, c_pad), jnp.bfloat16),  # H_k ping-pong (parity k%2)
            pltpu.VMEM((n_pad, c_pad), jnp.float32),      # gated accumulator
            pltpu.SemaphoreType.DMA((1,)),                # one-time H0 staging DMA
        ],
        compiler_params=pltpu.CompilerParams(
            # row blocks share the resident H/acc scratch across the k loop,
            # so both axes must stay sequential ("arbitrary").
            dimension_semantics=("arbitrary", "arbitrary"),
            vmem_limit_bytes=_vmem_limit(prop_fp, cap),
        ),
    )(h0, adj_q, adj_scale, pw_p, pb_p)

    return out_p[:n, :classes]


# ---------------------------------------------------------------------------
# pure-JAX reference (f32 throughout) + params
# ---------------------------------------------------------------------------
def dagnn_reference(x, edge_index, params, *, k_steps):
    w1, b1, w2, b2, pw, pb = params
    a_hat = _build_norm_adj(edge_index, x.shape[0])
    h = jnp.maximum(x @ w1 + b1, 0.0) @ w2 + b2
    cur = h
    acc = jax.nn.sigmoid(cur @ pw + pb) * cur
    for _ in range(k_steps):
        cur = a_hat @ cur
        acc = acc + jax.nn.sigmoid(cur @ pw + pb) * cur
    return jax.nn.log_softmax(acc, axis=1)


def init_params(key, features, hidden, classes):
    k1, k2, k3, k4, k5, k6 = jax.random.split(key, 6)
    w1 = jax.random.normal(k1, (features, hidden), jnp.float32) * 0.1
    b1 = jax.random.normal(k2, (1, hidden), jnp.float32) * 0.01
    w2 = jax.random.normal(k3, (hidden, classes), jnp.float32) * 0.1
    b2 = jax.random.normal(k4, (1, classes), jnp.float32) * 0.01
    pw = jax.random.normal(k5, (classes, 1), jnp.float32) * 0.1
    pb = jax.random.normal(k6, (1, 1), jnp.float32) * 0.01
    return (w1, b1, w2, b2, pw, pb)


if __name__ == "__main__":
    # TODO(synk): dropout layers are omitted (inference/eval semantics — identity).
    N, FEATURES, HIDDEN, CLASSES, K = 32, 16, 32, 8, 4

    key = jax.random.PRNGKey(0)
    kx, ke, kp = jax.random.split(key, 3)
    x = jax.random.normal(kx, (N, FEATURES), jnp.float32)
    E = 64
    src = jax.random.randint(ke, (E,), 0, N, dtype=jnp.int32)
    dst = jax.random.randint(jax.random.fold_in(ke, 1), (E,), 0, N, dtype=jnp.int32)
    edge_index = jnp.stack([src, dst], axis=0)

    params = init_params(kp, FEATURES, HIDDEN, CLASSES)

    fwd = jax.jit(functools.partial(dagnn_forward, k_steps=K))
    out = jax.block_until_ready(fwd(x, edge_index, params))

    assert out.shape == (N, CLASSES)
    assert bool(jnp.all(jnp.isfinite(out)))
    # rows of log_softmax exponentiate-sum to 1
    assert jnp.allclose(jnp.sum(jnp.exp(out), axis=1), 1.0, atol=1e-4)
    # matches the f32 reference up to bf16 + int8-adj propagation error
    ref = dagnn_reference(x, edge_index, params, k_steps=K)
    assert jnp.allclose(out, ref, atol=5e-2, rtol=5e-2), float(jnp.max(jnp.abs(out - ref)))
    print("KERNEL_OK")
</pallas_src>

<mosaic_0001>
module attributes {stable_mosaic.version = 11 : i64} {
  func.func @_mlp_kernel(%arg0: i32, %arg1: memref<128x128xbf16, #tpu.memory_space<vmem>>, %arg2: memref<128x128xbf16, #tpu.memory_space<vmem>>, %arg3: memref<1x128xf32, #tpu.memory_space<vmem>>, %arg4: memref<128x128xbf16, #tpu.memory_space<vmem>>, %arg5: memref<1x128xf32, #tpu.memory_space<vmem>>, %arg6: memref<128x128xbf16, #tpu.memory_space<vmem>>) attributes {dimension_semantics = [#tpu.dimension_semantics<parallel>], iteration_bounds = array<i64: 1>, scalar_prefetch = 0 : i64, scratch_operands = 0 : i64, tpu.core_type = #tpu.core_type<tc>, window_params = [{transform_indices = @transform_0, window_bounds = array<i64: 128, 128>}, {pipeline_mode = #tpu.pipeline_mode<synchronous>, transform_indices = @transform_1, window_bounds = array<i64: 128, 128>}, {pipeline_mode = #tpu.pipeline_mode<synchronous>, transform_indices = @transform_2, window_bounds = array<i64: 1, 128>}, {pipeline_mode = #tpu.pipeline_mode<synchronous>, transform_indices = @transform_3, window_bounds = array<i64: 128, 128>}, {pipeline_mode = #tpu.pipeline_mode<synchronous>, transform_indices = @transform_4, window_bounds = array<i64: 1, 128>}, {transform_indices = @transform_5, window_bounds = array<i64: 128, 128>}]} {
    %c0 = arith.constant 0 : index
    %c0_0 = arith.constant 0 : index
    %0 = vector.load %arg1[%c0, %c0_0] : memref<128x128xbf16, #tpu.memory_space<vmem>>, vector<128x128xbf16>
    %c0_1 = arith.constant 0 : index
    %c0_2 = arith.constant 0 : index
    %1 = vector.load %arg2[%c0_1, %c0_2] : memref<128x128xbf16, #tpu.memory_space<vmem>>, vector<128x128xbf16>
    %cst = arith.constant dense<0.000000e+00> : vector<128x128xf32>
    %2 = tpu.matmul %0, %1, %cst {dimension_numbers = #tpu.dot_dimension_numbers<[1], [0], [0], [1], [0, 0, 1, 1], [], []>} : vector<128x128xbf16>, vector<128x128xbf16>, vector<128x128xf32> -> vector<128x128xf32>
    %c0_3 = arith.constant 0 : index
    %c0_4 = arith.constant 0 : index
    %3 = vector.load %arg3[%c0_3, %c0_4] : memref<1x128xf32, #tpu.memory_space<vmem>>, vector<1x128xf32>
    %4 = vector.broadcast %3 : vector<1x128xf32> to vector<128x128xf32>
    %5 = arith.addf %2, %4 : vector<128x128xf32>
    %cst_5 = arith.constant 0.000000e+00 : f32
    %6 = vector.broadcast %cst_5 : f32 to vector<128x128xf32>
    %7 = arith.maximumf %5, %6 : vector<128x128xf32>
    %8 = arith.truncf %7 : vector<128x128xf32> to vector<128x128xbf16>
    %c0_6 = arith.constant 0 : index
    %c0_7 = arith.constant 0 : index
    %9 = vector.load %arg4[%c0_6, %c0_7] : memref<128x128xbf16, #tpu.memory_space<vmem>>, vector<128x128xbf16>
    %cst_8 = arith.constant dense<0.000000e+00> : vector<128x128xf32>
    %10 = tpu.matmul %8, %9, %cst_8 {dimension_numbers = #tpu.dot_dimension_numbers<[1], [0], [0], [1], [0, 0, 1, 1], [], []>} : vector<128x128xbf16>, vector<128x128xbf16>, vector<128x128xf32> -> vector<128x128xf32>
    %c0_9 = arith.constant 0 : index
    %c0_10 = arith.constant 0 : index
    %11 = vector.load %arg5[%c0_9, %c0_10] : memref<1x128xf32, #tpu.memory_space<vmem>>, vector<1x128xf32>
    %12 = vector.broadcast %11 : vector<1x128xf32> to vector<128x128xf32>
    %13 = arith.addf %10, %12 : vector<128x128xf32>
    %14 = arith.truncf %13 : vector<128x128xf32> to vector<128x128xbf16>
    %c0_11 = arith.constant 0 : index
    %c0_12 = arith.constant 0 : index
    %15 = vector.load %arg6[%c0_11, %c0_12] : memref<128x128xbf16, #tpu.memory_space<vmem>>, vector<128x128xbf16>
    tpu.vector_store %arg6[%c0_11, %c0_12], %14 {strides = array<i32>} : memref<128x128xbf16, #tpu.memory_space<vmem>>, vector<128x128xbf16>,
    return
  }
  func.func @transform_0(%arg0: i32) -> (i32, i32) {
    %c0_i32 = arith.constant 0 : i32
    %c0_i32_0 = arith.constant 0 : i32
    return %arg0, %c0_i32 : i32, i32
  }
  func.func @transform_1(%arg0: i32) -> (i32, i32) {
    %c0_i32 = arith.constant 0 : i32
    %c0_i32_0 = arith.constant 0 : i32
    %c0_i32_1 = arith.constant 0 : i32
    return %c0_i32, %c0_i32_0 : i32, i32
  }
  func.func @transform_2(%arg0: i32) -> (i32, i32) {
    %c0_i32 = arith.constant 0 : i32
    %c0_i32_0 = arith.constant 0 : i32
    %c0_i32_1 = arith.constant 0 : i32
    return %c0_i32, %c0_i32_0 : i32, i32
  }
  func.func @transform_3(%arg0: i32) -> (i32, i32) {
    %c0_i32 = arith.constant 0 : i32
    %c0_i32_0 = arith.constant 0 : i32
    %c0_i32_1 = arith.constant 0 : i32
    return %c0_i32, %c0_i32_0 : i32, i32
  }
  func.func @transform_4(%arg0: i32) -> (i32, i32) {
    %c0_i32 = arith.constant 0 : i32
    %c0_i32_0 = arith.constant 0 : i32
    %c0_i32_1 = arith.constant 0 : i32
    return %c0_i32, %c0_i32_0 : i32, i32
  }
  func.func @transform_5(%arg0: i32) -> (i32, i32) {
    %c0_i32 = arith.constant 0 : i32
    %c0_i32_0 = arith.constant 0 : i32
    return %arg0, %c0_i32 : i32, i32
  }
}

module attributes {stable_mosaic.version = 11 : i64} {
  func.func @kernel(%arg0: i32, %arg1: i32, %arg2: memref<128x128xbf16, #tpu.memory_space<any>>, %arg3: memref<128x128xi8, #tpu.memory_space<vmem>>, %arg4: memref<128x1xf32, #tpu.memory_space<vmem>>, %arg5: memref<1x128xf32, #tpu.memory_space<vmem>>, %arg6: memref<1x1xf32, #tpu.memory_space<smem>>, %arg7: memref<128x128xf32, #tpu.memory_space<vmem>>, %arg8: memref<2x128x128xbf16, #tpu.memory_space<vmem>>, %arg9: memref<128x128xf32, #tpu.memory_space<vmem>>, %arg10: memref<1x!tpu.dma_semaphore, #tpu.memory_space<semaphore_mem>>) attributes {dimension_semantics = [#tpu.dimension_semantics<arbitrary>, #tpu.dimension_semantics<arbitrary>], iteration_bounds = array<i64: 4, 1>, scalar_prefetch = 0 : i64, scratch_operands = 3 : i64, tpu.core_type = #tpu.core_type<tc>, window_params = [{}, {transform_indices = @transform_1, window_bounds = array<i64: 128, 128>}, {transform_indices = @transform_2, window_bounds = array<i64: 128, 1>}, {pipeline_mode = #tpu.pipeline_mode<synchronous>, transform_indices = @transform_3, window_bounds = array<i64: 1, 128>}, {transform_indices = @transform_4, window_bounds = array<i64: 1, 1>}, {transform_indices = @transform_5, window_bounds = array<i64: 128, 128>}]} {
    %c128_i32 = arith.constant 128 : i32
    %0 = arith.muli %arg1, %c128_i32 : i32
    %1 = tpu.assume_multiple %0, 128 : i32
    %c2_i32 = arith.constant 2 : i32
    %2 = arith.remsi %arg0, %c2_i32 : i32
    %c1_i32 = arith.constant 1 : i32
    %3 = arith.subi %c1_i32, %2 : i32
    %c0 = arith.constant 0 : index
    %c0_0 = arith.constant 0 : index
    %4 = vector.load %arg5[%c0, %c0_0] : memref<1x128xf32, #tpu.memory_space<vmem>>, vector<1x128xf32>
    %c0_1 = arith.constant 0 : index
    %c0_2 = arith.constant 0 : index
    %5 = memref.load %arg6[%c0_1, %c0_2] : memref<1x1xf32, #tpu.memory_space<smem>>
    %c0_i32 = arith.constant 0 : i32
    %6 = arith.cmpi eq, %arg0, %c0_i32 : i32
    %c0_i32_3 = arith.constant 0 : i32
    %7 = arith.cmpi eq, %arg1, %c0_i32_3 : i32
    %8 = arith.andi %6, %7 : i1
    %9 = arith.extui %8 : i1 to i32
    %c0_i32_4 = arith.constant 0 : i32
    %10 = arith.cmpi ne, %9, %c0_i32_4 : i32
    scf.if %10 {
      %c0_i32_20 = arith.constant 0 : i32
      %c0_i32_21 = arith.constant 0 : i32
      %c0_i32_22 = arith.constant 0 : i32
      %c0_i32_23 = arith.constant 0 : i32
      %47 = tpu.memref_slice %arg8[%c0_i32_20, %c0_i32_22, %c0_i32_23] : memref<2x128x128xbf16, #tpu.memory_space<vmem>> -> memref<1x128x128xbf16, #tpu.memory_space<vmem>>
      %48 = tpu.memref_squeeze %47 : memref<1x128x128xbf16, #tpu.memory_space<vmem>> -> memref<128x128xbf16, #tpu.memory_space<vmem>>
      %49 = tpu.memref_slice %arg10[%c0_i32_21] : memref<1x!tpu.dma_semaphore, #tpu.memory_space<semaphore_mem>> -> memref<1x!tpu.dma_semaphore, #tpu.memory_space<semaphore_mem>>
      %50 = tpu.memref_squeeze %49 : memref<1x!tpu.dma_semaphore, #tpu.memory_space<semaphore_mem>> -> memref<!tpu.dma_semaphore, #tpu.memory_space<semaphore_mem>>
      tpu.enqueue_dma source(%arg2 : memref<128x128xbf16, #tpu.memory_space<any>>) target(%48 : memref<128x128xbf16, #tpu.memory_space<vmem>>) target_semaphore(%50 : memref<!tpu.dma_semaphore, #tpu.memory_space<semaphore_mem>>)
      %c0_i32_24 = arith.constant 0 : i32
      %c0_i32_25 = arith.constant 0 : i32
      %c0_i32_26 = arith.constant 0 : i32
      %c0_i32_27 = arith.constant 0 : i32
      %51 = tpu.memref_slice %arg8[%c0_i32_24, %c0_i32_26, %c0_i32_27] : memref<2x128x128xbf16, #tpu.memory_space<vmem>> -> memref<1x128x128xbf16, #tpu.memory_space<vmem>>
      %52 = tpu.memref_squeeze %51 : memref<1x128x128xbf16, #tpu.memory_space<vmem>> -> memref<128x128xbf16, #tpu.memory_space<vmem>>
      %53 = tpu.memref_slice %arg10[%c0_i32_25] : memref<1x!tpu.dma_semaphore, #tpu.memory_space<semaphore_mem>> -> memref<1x!tpu.dma_semaphore, #tpu.memory_space<semaphore_mem>>
      %54 = tpu.memref_squeeze %53 : memref<1x!tpu.dma_semaphore, #tpu.memory_space<semaphore_mem>> -> memref<!tpu.dma_semaphore, #tpu.memory_space<semaphore_mem>>
      tpu.wait_dma2 semaphore(%54 : memref<!tpu.dma_semaphore, #tpu.memory_space<semaphore_mem>>) src(%arg2 : memref<128x128xbf16, #tpu.memory_space<any>>) dst(%52 : memref<128x128xbf16, #tpu.memory_space<vmem>>)
    } else {
    }
    %c0_i32_5 = arith.constant 0 : i32
    %11 = arith.cmpi eq, %arg0, %c0_i32_5 : i32
    %12 = arith.extui %11 : i1 to i32
    %c0_i32_6 = arith.constant 0 : i32
    %13 = arith.cmpi ne, %12, %c0_i32_6 : i32
    scf.if %13 {
      %c0_20 = arith.constant 0 : index
      %47 = arith.index_cast %1 : i32 to index
      %c0_21 = arith.constant 0 : index
      %48 = vector.load %arg8[%c0_20, %47, %c0_21] : memref<2x128x128xbf16, #tpu.memory_space<vmem>>, vector<1x128x128xbf16>
      %49 = vector.shape_cast %48 : vector<1x128x128xbf16> to vector<128x128xbf16>
      %50 = arith.extf %49 : vector<128x128xbf16> to vector<128x128xf32>
      %51 = vector.broadcast %4 : vector<1x128xf32> to vector<128x128xf32>
      %52 = arith.mulf %50, %51 : vector<128x128xf32>
      %cst_22 = arith.constant dense<0.000000e+00> : vector<128xf32>
      %53 = vector.multi_reduction <add>, %52, %cst_22 [1] : vector<128x128xf32> to vector<128xf32>
      %54 = vector.shape_cast %53 : vector<128xf32> to vector<128x1xf32>
      %55 = vector.broadcast %5 : f32 to vector<128x1xf32>
      %56 = arith.addf %54, %55 : vector<128x1xf32>
      %57 = arith.negf %56 : vector<128x1xf32>
      %58 = math.exp %57 : vector<128x1xf32>
      %cst_23 = arith.constant 1.000000e+00 : f32
      %59 = vector.broadcast %cst_23 : f32 to vector<128x1xf32>
      %60 = arith.addf %59, %58 : vector<128x1xf32>
      %61 = arith.divf %59, %60 : vector<128x1xf32>
      %62 = vector.broadcast %61 : vector<128x1xf32> to vector<128x128xf32>
      %63 = arith.mulf %62, %50 : vector<128x128xf32>
      %64 = arith.index_cast %1 : i32 to index
      %c0_24 = arith.constant 0 : index
      %65 = vector.load %arg9[%64, %c0_24] : memref<128x128xf32, #tpu.memory_space<vmem>>, vector<128x128xf32>
      tpu.vector_store %arg9[%64, %c0_24], %63 {strides = array<i32>} : memref<128x128xf32, #tpu.memory_space<vmem>>, vector<128x128xf32>,
    } else {
    }
    %c0_7 = arith.constant 0 : index
    %c0_8 = arith.constant 0 : index
    %14 = vector.load %arg3[%c0_7, %c0_8] : memref<128x128xi8, #tpu.memory_space<vmem>>, vector<128x128xi8>
    %15 = arith.sitofp %14 : vector<128x128xi8> to vector<128x128xbf16>
    %16 = arith.index_cast %2 : i32 to index
    %c0_9 = arith.constant 0 : index
    %c0_10 = arith.constant 0 : index
    %17 = vector.load %arg8[%16, %c0_9, %c0_10] : memref<2x128x128xbf16, #tpu.memory_space<vmem>>, vector<1x128x128xbf16>
    %18 = vector.shape_cast %17 : vector<1x128x128xbf16> to vector<128x128xbf16>
    %cst = arith.constant dense<0.000000e+00> : vector<128x128xf32>
    %19 = tpu.matmul %15, %18, %cst {dimension_numbers = #tpu.dot_dimension_numbers<[1], [0], [0], [1], [0, 0, 1, 1], [], []>} : vector<128x128xbf16>, vector<128x128xbf16>, vector<128x128xf32> -> vector<128x128xf32>
    %c0_11 = arith.constant 0 : index
    %c0_12 = arith.constant 0 : index
    %20 = vector.load %arg4[%c0_11, %c0_12] : memref<128x1xf32, #tpu.memory_space<vmem>>, vector<128x1xf32>
    %21 = vector.broadcast %20 : vector<128x1xf32> to vector<128x128xf32>
    %22 = arith.mulf %19, %21 : vector<128x128xf32>
    %23 = vector.broadcast %4 : vector<1x128xf32> to vector<128x128xf32>
    %24 = arith.mulf %22, %23 : vector<128x128xf32>
    %cst_13 = arith.constant dense<0.000000e+00> : vector<128xf32>
    %25 = vector.multi_reduction <add>, %24, %cst_13 [1] : vector<128x128xf32> to vector<128xf32>
    %26 = vector.shape_cast %25 : vector<128xf32> to vector<128x1xf32>
    %27 = vector.broadcast %5 : f32 to vector<128x1xf32>
    %28 = arith.addf %26, %27 : vector<128x1xf32>
    %29 = arith.negf %28 : vector<128x1xf32>
    %30 = math.exp %29 : vector<128x1xf32>
    %cst_14 = arith.constant 1.000000e+00 : f32
    %31 = vector.broadcast %cst_14 : f32 to vector<128x1xf32>
    %32 = arith.addf %31, %30 : vector<128x1xf32>
    %33 = arith.divf %31, %32 : vector<128x1xf32>
    %34 = arith.index_cast %1 : i32 to index
    %c0_15 = arith.constant 0 : index
    %35 = vector.load %arg9[%34, %c0_15] : memref<128x128xf32, #tpu.memory_space<vmem>>, vector<128x128xf32>
    %36 = vector.broadcast %33 : vector<128x1xf32> to vector<128x128xf32>
    %37 = arith.mulf %36, %22 : vector<128x128xf32>
    %38 = arith.addf %35, %37 : vector<128x128xf32>
    %39 = arith.index_cast %1 : i32 to index
    %c0_16 = arith.constant 0 : index
    %40 = vector.load %arg9[%39, %c0_16] : memref<128x128xf32, #tpu.memory_space<vmem>>, vector<128x128xf32>
    tpu.vector_store %arg9[%39, %c0_16], %38 {strides = array<i32>} : memref<128x128xf32, #tpu.memory_space<vmem>>, vector<128x128xf32>,
    %c3_i32 = arith.constant 3 : i32
    %41 = arith.cmpi slt, %arg0, %c3_i32 : i32
    %42 = arith.extui %41 : i1 to i32
    %c0_i32_17 = arith.constant 0 : i32
    %43 = arith.cmpi ne, %42, %c0_i32_17 : i32
    scf.if %43 {
      %47 = arith.truncf %22 : vector<128x128xf32> to vector<128x128xbf16>
      %48 = arith.index_cast %3 : i32 to index
      %49 = arith.index_cast %1 : i32 to index
      %c0_20 = arith.constant 0 : index
      %50 = vector.load %arg8[%48, %49, %c0_20] : memref<2x128x128xbf16, #tpu.memory_space<vmem>>, vector<1x128x128xbf16>
      %51 = vector.shape_cast %50 : vector<1x128x128xbf16> to vector<128x128xbf16>
      %52 = vector.shape_cast %47 : vector<128x128xbf16> to vector<1x128x128xbf16>
      tpu.vector_store %arg8[%48, %49, %c0_20], %52 {strides = array<i32>} : memref<2x128x128xbf16, #tpu.memory_space<vmem>>, vector<1x128x128xbf16>,
    } else {
    }
    %c3_i32_18 = arith.constant 3 : i32
    %44 = arith.cmpi eq, %arg0, %c3_i32_18 : i32
    %45 = arith.extui %44 : i1 to i32
    %c0_i32_19 = arith.constant 0 : i32
    %46 = arith.cmpi ne, %45, %c0_i32_19 : i32
    scf.if %46 {
      %47 = arith.index_cast %1 : i32 to index
      %c0_20 = arith.constant 0 : index
      %48 = vector.load %arg9[%47, %c0_20] : memref<128x128xf32, #tpu.memory_space<vmem>>, vector<128x128xf32>
      %49 = tpu.iota {dimensions = array<i32: 1>} : vector<128x128xi32>
      %c8_i32 = arith.constant 8 : i32
      %50 = vector.broadcast %c8_i32 : i32 to vector<128x128xi32>
      %51 = arith.cmpi slt, %49, %50 : vector<128x128xi32>
      %cst_21 = arith.constant -1.000000e+30 : f32
      %52 = vector.broadcast %cst_21 : f32 to vector<128x128xf32>
      %53 = arith.select %51, %48, %52 : vector<128x128xi1>, vector<128x128xf32>
      %cst_22 = arith.constant dense<0xFF800000> : vector<128xf32>
      %54 = vector.multi_reduction <maximumf>, %53, %cst_22 [1] : vector<128x128xf32> to vector<128xf32>
      %55 = vector.shape_cast %54 : vector<128xf32> to vector<128x1xf32>
      %56 = vector.broadcast %55 : vector<128x1xf32> to vector<128x128xf32>
      %57 = arith.subf %48, %56 : vector<128x128xf32>
      %58 = math.exp %57 : vector<128x128xf32>
      %cst_23 = arith.constant 0.000000e+00 : f32
      %59 = vector.broadcast %cst_23 : f32 to vector<128x128xf32>
      %60 = arith.select %51, %58, %59 : vector<128x128xi1>, vector<128x128xf32>
      %cst_24 = arith.constant dense<0.000000e+00> : vector<128xf32>
      %61 = vector.multi_reduction <add>, %60, %cst_24 [1] : vector<128x128xf32> to vector<128xf32>
      %62 = vector.shape_cast %61 : vector<128xf32> to vector<128x1xf32>
      %63 = math.log %62 : vector<128x1xf32>
      %64 = vector.broadcast %63 : vector<128x1xf32> to vector<128x128xf32>
      %65 = arith.subf %57, %64 : vector<128x128xf32>
      %c0_25 = arith.constant 0 : index
      %c0_26 = arith.constant 0 : index
      %66 = vector.load %arg7[%c0_25, %c0_26] : memref<128x128xf32, #tpu.memory_space<vmem>>, vector<128x128xf32>
      tpu.vector_store %arg7[%c0_25, %c0_26], %65 {strides = array<i32>} : memref<128x128xf32, #tpu.memory_space<vmem>>, vector<128x128xf32>,
    } else {
    }
    return
  }
  func.func @transform_1(%arg0: i32, %arg1: i32) -> (i32, i32) {
    %c0_i32 = arith.constant 0 : i32
    %c0_i32_0 = arith.constant 0 : i32
    return %arg1, %c0_i32 : i32, i32
  }
  func.func @transform_2(%arg0: i32, %arg1: i32) -> (i32, i32) {
    %c0_i32 = arith.constant 0 : i32
    %c0_i32_0 = arith.constant 0 : i32
    return %arg1, %c0_i32 : i32, i32
  }
  func.func @transform_3(%arg0: i32, %arg1: i32) -> (i32, i32) {
    %c0_i32 = arith.constant 0 : i32
    %c0_i32_0 = arith.constant 0 : i32
    %c0_i32_1 = arith.constant 0 : i32
    return %c0_i32, %c0_i32_0 : i32, i32
  }
  func.func @transform_4(%arg0: i32, %arg1: i32) -> (i32, i32) {
    %c0_i32 = arith.constant 0 : i32
    %c0_i32_0 = arith.constant 0 : i32
    %c0_i32_1 = arith.constant 0 : i32
    return %c0_i32, %c0_i32_0 : i32, i32
  }
  func.func @transform_5(%arg0: i32, %arg1: i32) -> (i32, i32) {
    %c0_i32 = arith.constant 0 : i32
    %c0_i32_0 = arith.constant 0 : i32
    return %arg1, %c0_i32 : i32, i32
  }
}

</mosaic_0001>

<bundles_post_ra>
// kernel: dagnn_forward.2
= control target key start
LH: loop header
LB: loop body
LE: loop exit
PB: predicated region body
PF: predicated region fallthrough
CT: control target
= control target key end

     0   :  { %s695_s1 = inlined_call_operand.vmem [shape: bf16[128,128], index: 1, kind: input, shape index: {}]   ;;  %s696_s2 = inlined_call_operand.vmem [shape: f32[1,128], index: 2, kind: input, shape index: {}]   ;;  %s697_s0 = inlined_call_operand.vmem [shape: bf16[128,128], index: 0, kind: input, shape index: {}]   ;;  %s698_s3 = inlined_call_operand.vmem [shape: bf16[128,128], index: 3, kind: input, shape index: {}]   ;;  %s699_s4 = inlined_call_operand.vmem [shape: f32[1,128], index: 4, kind: input, shape index: {}]   ;;  %s700_s5 = inlined_call_operand.vmem [shape: bf16[128,128], index: 5, kind: output, shape index: {}]  }
   0x1   :  { %v489_v0 = vld [vmem:[%s695_s1 + $0x38] sm:$0xff]  ;;  %v488_v1 = vld [vmem:[%s695_s1 + $0x30] sm:$0xff]  ;;  %v487_v2 = vld [vmem:[%s695_s1 + $0x28] sm:$0xff] }
   0x2   :  { %152 = vmatpush.bf16.msra.mxu0 %v489_v0  ;;  %545 = vmatpush.bf16.msra.mxu2 %v489_v0  ;;  %v486_v3 = vld [vmem:[%s695_s1 + $0x20] sm:$0xff]  ;;  %v485_v4 = vld [vmem:[%s695_s1 + $0x18] sm:$0xff]  ;;  %v484_v5 = vld [vmem:[%s695_s1 + $0x10] sm:$0xff] }
   0x3   :  { %v483_v6 = vld [vmem:[%s695_s1 + $0x8] sm:$0xff]  ;;  %v482_v7 = vld [vmem:[%s695_s1] sm:$0xff]  ;;  %v497_v12 = vld [vmem:[%s698_s3 + $0x38] sm:$0xff] }
   0x4   :  { %v474_v8 = vld [vmem:[%s697_s0] sm:$0xff]  ;;  %v475_v10 = vld [vmem:[%s697_s0 + $0x8] sm:$0xff]  ;;  %293 = vmatpush.bf16.msra.mxu1 %v497_v12  ;;  %v496_v13 = vld [vmem:[%s698_s3 + $0x30] sm:$0xff]  ;;  %553 = vmatpush.bf16.msra.mxu3 %v497_v12 }
   0x5   :  { %v478_v9 = vld [vmem:[%s697_s0 + $0x20] sm:$0xff]  ;;  %v479_v11 = vld [vmem:[%s697_s0 + $0x28] sm:$0xff]  ;;  %v476_v16 = vld [vmem:[%s697_s0 + $0x10] sm:$0xff] }
   0x6   :  { %153 = vmatpush.bf16.msra.mxu0 %v488_v1  ;;  %546 = vmatpush.bf16.msra.mxu2 %v488_v1  ;;  %v495_v14 = vld [vmem:[%s698_s3 + $0x28] sm:$0xff]  ;;  %v494_v15 = vld [vmem:[%s698_s3 + $0x20] sm:$0xff]  ;;  %v480_v17 = vld [vmem:[%s697_s0 + $0x30] sm:$0xff] }
   0x7   :  { %v477_v18 = vld [vmem:[%s697_s0 + $0x18] sm:$0xff]  ;;  %v492_v21 = vld [vmem:[%s698_s3 + $0x10] sm:$0xff]  ;;  %v491_v22 = vld [vmem:[%s698_s3 + $0x8] sm:$0xff] }
   0x8   :  { %294 = vmatpush.bf16.msra.mxu1 %v496_v13  ;;  %554 = vmatpush.bf16.msra.mxu3 %v496_v13  ;;  %v481_v19 = vld [vmem:[%s697_s0 + $0x38] sm:$0xff]  ;;  %v490_v23 = vld [vmem:[%s698_s3] sm:$0xff] }
   0x9   :  { %v493_v20 = vld [vmem:[%s698_s3 + $0x18] sm:$0xff]  ;;  %v561_v25 = vld [vmem:[%s696_s2] ss:$0 sm:$0xff] }
   0xa   :  { %154 = vmatpush.bf16.msra.mxu0 %v487_v2  ;;  %547 = vmatpush.bf16.msra.mxu2 %v487_v2 }
   0xc   :  { %295 = vmatpush.bf16.msra.mxu1 %v495_v14  ;;  %555 = vmatpush.bf16.msra.mxu3 %v495_v14 }
   0xe   :  { %155 = vmatpush.bf16.msra.mxu0 %v486_v3  ;;  %548 = vmatpush.bf16.msra.mxu2 %v486_v3 }
  0x10   :  { %296 = vmatpush.bf16.msra.mxu1 %v494_v15  ;;  %556 = vmatpush.bf16.msra.mxu3 %v494_v15 }
  0x12   :  { %156 = vmatpush.bf16.msra.mxu0 %v485_v4  ;;  %549 = vmatpush.bf16.msra.mxu2 %v485_v4 }
  0x14   :  { %297 = vmatpush.bf16.msra.mxu1 %v493_v20  ;;  %557 = vmatpush.bf16.msra.mxu3 %v493_v20 }
  0x16   :  { %157 = vmatpush.bf16.msra.mxu0 %v484_v5  ;;  %550 = vmatpush.bf16.msra.mxu2 %v484_v5 }
  0x18   :  { %298 = vmatpush.bf16.msra.mxu1 %v492_v21  ;;  %558 = vmatpush.bf16.msra.mxu3 %v492_v21 }
  0x1a   :  { %158 = vmatpush.bf16.msra.mxu0 %v483_v6  ;;  %551 = vmatpush.bf16.msra.mxu2 %v483_v6 }
  0x1c   :  { %299 = vmatpush.bf16.msra.mxu1 %v491_v22  ;;  %559 = vmatpush.bf16.msra.mxu3 %v491_v22 }
  0x1e   :  { %159 = vmatpush.bf16.msra.mxu0 %v482_v7  ;;  %552 = vmatpush.bf16.msra.mxu2 %v482_v7 }
  0x20   :  { %300 = vmatpush.bf16.msra.mxu1 %v490_v23  ;;  %560 = vmatpush.bf16.msra.mxu3 %v490_v23 }
  0x21   :  { %160 = vmatmul.bf16.vlgmr.msra.gmra.mxu0 %v474_v8  ;;  %180 = vmatmul.bf16.vlgmr.msra.gmra.mxu2 %v478_v9 }
  0x31   :  { %165 = vmatmul.bf16.gmra.mxu0 %v475_v10  ;;  %185 = vmatmul.bf16.gmra.mxu2 %v479_v11 }
  0x41   :  { %170 = vmatmul.bf16.gmra.mxu0 %v476_v16  ;;  %190 = vmatmul.bf16.gmra.mxu2 %v480_v17 }
  0x51   :  { %175 = vmatmul.bf16.gmra.mxu0 %v477_v18  ;;  %195 = vmatmul.bf16.gmra.mxu2 %v481_v19  ;;  %v562_v18 = vld [vmem:[%s699_s4] ss:$0 sm:$0xff] }
  0x9e   :  { %v161_v24 = vpop.f32.mrf.mxu0 }
  0x9f   :  { %v162_v26 = vadd.f32 %v561_v25, %v161_v24 }
  0xa1   :  { %v201_v29 = vmax.f32 %v162_v26, 0.0 }
  0xa4   :  { %v181_v27 = vpop.f32.mrf.mxu2 }
  0xa5   :  { %v182_v32 = vadd.f32 %v561_v25, %v181_v27 }
  0xa6   :  { %v163_v28 = vpop.f32.mrf.mxu0 }
  0xa7   :  { %v164_v30 = vadd.f32 %v561_v25, %v163_v28  ;;  %v209_v37 = vmax.f32 %v182_v32, 0.0 }
  0xa9   :  { %v202_v31 = vmax.f32 %v164_v30, 0.0 }
  0xab   :  { %v217_v33 = vpack.c.bf16 %v202_v31, %v201_v29 }
  0xac   :  { %v183_v34 = vpop.f32.mrf.mxu2 }
  0xad   :  { %v184_v35 = vadd.f32 %v561_v25, %v183_v34  ;;  %301 = vmatmul.bf16.vlgmr.msra.gmra.mxu1 %v217_v33 }
  0xae   :  { %v166_v36 = vpop.f32.mrf.mxu0 }
  0xaf   :  { %v210_v38 = vmax.f32 %v184_v35, 0.0  ;;  %v167_v40 = vadd.f32 %v561_v25, %v166_v36 }
  0xb1   :  { %v221_v39 = vpack.c.bf16 %v210_v38, %v209_v37  ;;  %v203_v43 = vmax.f32 %v167_v40, 0.0 }
  0xb3   :  { %321 = vmatmul.bf16.vlgmr.msra.gmra.mxu3 %v221_v39 }
  0xb4   :  { %v186_v41 = vpop.f32.mrf.mxu2 }
  0xb5   :  { %v187_v46 = vadd.f32 %v561_v25, %v186_v41 }
  0xb6   :  { %v168_v42 = vpop.f32.mrf.mxu0 }
  0xb7   :  { %v169_v44 = vadd.f32 %v561_v25, %v168_v42  ;;  %v211_v51 = vmax.f32 %v187_v46, 0.0 }
  0xb9   :  { %v204_v45 = vmax.f32 %v169_v44, 0.0 }
  0xbb   :  { %v218_v47 = vpack.c.bf16 %v204_v45, %v203_v43 }
  0xbc   :  { %v188_v48 = vpop.f32.mrf.mxu2 }
  0xbd   :  { %v189_v49 = vadd.f32 %v561_v25, %v188_v48  ;;  %306 = vmatmul.bf16.gmra.mxu1 %v218_v47 }
  0xbe   :  { %v171_v50 = vpop.f32.mrf.mxu0 }
  0xbf   :  { %v212_v52 = vmax.f32 %v189_v49, 0.0  ;;  %v172_v54 = vadd.f32 %v561_v25, %v171_v50 }
  0xc1   :  { %v222_v53 = vpack.c.bf16 %v212_v52, %v211_v51  ;;  %v205_v57 = vmax.f32 %v172_v54, 0.0 }
  0xc3   :  { %326 = vmatmul.bf16.gmra.mxu3 %v222_v53 }
  0xc4   :  { %v191_v55 = vpop.f32.mrf.mxu2 }
  0xc5   :  { %v192_v60 = vadd.f32 %v561_v25, %v191_v55 }
  0xc6   :  { %v173_v56 = vpop.f32.mrf.mxu0 }
  0xc7   :  { %v174_v58 = vadd.f32 %v561_v25, %v173_v56  ;;  %v213_v1 = vmax.f32 %v192_v60, 0.0 }
  0xc9   :  { %v206_v59 = vmax.f32 %v174_v58, 0.0 }
  0xcb   :  { %v219_v61 = vpack.c.bf16 %v206_v59, %v205_v57 }
  0xcc   :  { %v193_v62 = vpop.f32.mrf.mxu2 }
  0xcd   :  { %v194_v63 = vadd.f32 %v561_v25, %v193_v62  ;;  %311 = vmatmul.bf16.gmra.mxu1 %v219_v61 }
  0xce   :  { %v176_v0 = vpop.f32.mrf.mxu0 }
  0xcf   :  { %v214_v2 = vmax.f32 %v194_v63, 0.0  ;;  %v177_v4 = vadd.f32 %v561_v25, %v176_v0 }
  0xd1   :  { %v223_v3 = vpack.c.bf16 %v214_v2, %v213_v1  ;;  %v207_v7 = vmax.f32 %v177_v4, 0.0 }
  0xd3   :  { %331 = vmatmul.bf16.gmra.mxu3 %v223_v3 }
  0xd4   :  { %v196_v5 = vpop.f32.mrf.mxu2 }
  0xd5   :  { %v197_v10 = vadd.f32 %v561_v25, %v196_v5 }
  0xd6   :  { %v178_v6 = vpop.f32.mrf.mxu0 }
  0xd7   :  { %v179_v8 = vadd.f32 %v561_v25, %v178_v6  ;;  %v215_v14 = vmax.f32 %v197_v10, 0.0 }
  0xd9   :  { %v208_v9 = vmax.f32 %v179_v8, 0.0 }
  0xdb   :  { %v220_v11 = vpack.c.bf16 %v208_v9, %v207_v7 }
  0xdc   :  { %v198_v12 = vpop.f32.mrf.mxu2 }
  0xdd   :  { %v199_v13 = vadd.f32 %v561_v25, %v198_v12  ;;  %316 = vmatmul.bf16.gmra.mxu1 %v220_v11 }
  0xdf   :  { %v216_v15 = vmax.f32 %v199_v13, 0.0 }
  0xe1   :  { %v224_v16 = vpack.c.bf16 %v216_v15, %v215_v14 }
  0xe3   :  { %336 = vmatmul.bf16.gmra.mxu3 %v224_v16 }
 0x12a   :  { %v302_v17 = vpop.f32.mrf.mxu1 }
 0x12b   :  { %v303_v20 = vadd.f32 %v562_v18, %v302_v17 }
 0x132   :  { %v304_v19 = vpop.f32.mrf.mxu1 }
 0x133   :  { %v305_v21 = vadd.f32 %v562_v18, %v304_v19 }
 0x135   :  { %v501_v22 = vpack.c.bf16 %v305_v21, %v303_v20 }
 0x136   :  { %v322_v23 = vpop.f32.mrf.mxu3 }
 0x137   :  { %502 = vst [vmem:[%s700_s5] sm:$0xff] %v501_v22   ;;  %v323_v26 = vadd.f32 %v562_v18, %v322_v23 }
 0x13a   :  { %v307_v24 = vpop.f32.mrf.mxu1 }
 0x13b   :  { %v308_v30 = vadd.f32 %v562_v18, %v307_v24 }
 0x13e   :  { %v324_v25 = vpop.f32.mrf.mxu3 }
 0x13f   :  { %v325_v27 = vadd.f32 %v562_v18, %v324_v25 }
 0x141   :  { %v521_v28 = vpack.c.bf16 %v325_v27, %v323_v26 }
 0x142   :  { %v309_v29 = vpop.f32.mrf.mxu1 }
 0x143   :  { %541 = vst [vmem:[%s700_s5 + $0x20] sm:$0xff] %v521_v28   ;;  %v310_v31 = vadd.f32 %v562_v18, %v309_v29 }
 0x145   :  { %v506_v32 = vpack.c.bf16 %v310_v31, %v308_v30 }
 0x146   :  { %v327_v33 = vpop.f32.mrf.mxu3 }
 0x147   :  { %538 = vst [vmem:[%s700_s5 + $0x8] sm:$0xff] %v506_v32   ;;  %v328_v36 = vadd.f32 %v562_v18, %v327_v33 }
 0x14a   :  { %v312_v34 = vpop.f32.mrf.mxu1 }
 0x14b   :  { %v313_v40 = vadd.f32 %v562_v18, %v312_v34 }
 0x14e   :  { %v329_v35 = vpop.f32.mrf.mxu3 }
 0x14f   :  { %v330_v37 = vadd.f32 %v562_v18, %v329_v35 }
 0x151   :  { %v526_v38 = vpack.c.bf16 %v330_v37, %v328_v36 }
 0x152   :  { %v314_v39 = vpop.f32.mrf.mxu1 }
 0x153   :  { %542 = vst [vmem:[%s700_s5 + $0x28] sm:$0xff] %v526_v38   ;;  %v315_v41 = vadd.f32 %v562_v18, %v314_v39 }
 0x155   :  { %v511_v42 = vpack.c.bf16 %v315_v41, %v313_v40 }
 0x156   :  { %v332_v43 = vpop.f32.mrf.mxu3 }
 0x157   :  { %539 = vst [vmem:[%s700_s5 + $0x10] sm:$0xff] %v511_v42   ;;  %v333_v46 = vadd.f32 %v562_v18, %v332_v43 }
 0x15a   :  { %v317_v44 = vpop.f32.mrf.mxu1 }
 0x15b   :  { %v318_v50 = vadd.f32 %v562_v18, %v317_v44 }
 0x15e   :  { %v334_v45 = vpop.f32.mrf.mxu3 }
 0x15f   :  { %v335_v47 = vadd.f32 %v562_v18, %v334_v45 }
 0x161   :  { %v531_v48 = vpack.c.bf16 %v335_v47, %v333_v46 }
 0x162   :  { %v319_v49 = vpop.f32.mrf.mxu1 }
 0x163   :  { %543 = vst [vmem:[%s700_s5 + $0x30] sm:$0xff] %v531_v48   ;;  %v320_v51 = vadd.f32 %v562_v18, %v319_v49 }
 0x165   :  { %v516_v52 = vpack.c.bf16 %v320_v51, %v318_v50 }
 0x166   :  { %v337_v53 = vpop.f32.mrf.mxu3 }
 0x167   :  { %540 = vst [vmem:[%s700_s5 + $0x18] sm:$0xff] %v516_v52   ;;  %v338_v55 = vadd.f32 %v562_v18, %v337_v53 }
 0x16e   :  { %v339_v54 = vpop.f32.mrf.mxu3 }
 0x16f   :  { %v340_v56 = vadd.f32 %v562_v18, %v339_v54 }
 0x171   :  { %v536_v57 = vpack.c.bf16 %v340_v56, %v338_v55 }
 0x173   :  { %544 = vst [vmem:[%s700_s5 + $0x38] sm:$0xff] %v536_v57  }

// kernel: dagnn_forward.3
= control target key start
LH: loop header
LB: loop body
LE: loop exit
PB: predicated region body
PF: predicated region fallthrough
CT: control target
= control target key end

     0   :  { %s2301_s20 = smov 0   ;;  %s2303_s21 = smov 0   ;;  %s3317_s0 = inlined_call_operand.vmem [shape: bf16[128,128], index: 0, kind: input, shape index: {}]   ;;  %s3318_s1 = inlined_call_operand.vmem [shape: s8[128,128], index: 1, kind: input, shape index: {}]   ;;  %s3319_s2 = inlined_call_operand.vmem [shape: f32[128,1], index: 2, kind: input, shape index: {}]   ;;  %s3320_s3 = inlined_call_operand.vmem [shape: f32[1,128], index: 3, kind: input, shape index: {}]   ;;  %s3321_s4 = inlined_call_operand.<no memory space> [shape: f32[1,1], index: 4, kind: input, shape index: {}]   ;;  %s3322_s5 = inlined_call_operand.vmem [shape: f32[128,128], index: 5, kind: output, shape index: {}]  }
   0x1   :  { %10 = sst [smem:[#allocation5]] %s3321_s4  ;;  %s2305_s22 = smov 0  }
   0x2 LB: > { %s28_s4 = sadd.s32 1, %s2261_s21  ;;  %p1821_p0 = scmp.ge.s32.totalorder %s2265_s22, 1  ;;  %s2265_s22 = sphi %s2305_s22, %s16_s22   ;;  %s2261_s21 = sphi %s2303_s21, %s3366_s21   ;;  %s2257_s20 = sphi %s2301_s20, %s3365_s20  }
   0x3   : > { %p30_p1 = scmp.ge.s32.totalorder %s28_s4, 4  ;;  %p188_p2 = scmp.lt.s32.totalorder %s2265_s22, 5 }
   0x5   : > { %s3368_s4 = smov (%p30_p1, %s28_s4), 0  ;;  %p189_p3 = pnand %p1821_p0, %p188_p2 }
   0x6   : > { %p238_p4 = scmp.lt.s32.totalorder (!%p189_p3), %s2257_s20, 0  ;;  %s239_s23 = ssub.s32 (!%p189_p3), 0, %s2257_s20 }
   0x7   : > { %192 = sbr.rel (%p189_p3) target bundleno = 950 (0x3b6), region = 36  ;;  %s1822_s26 = smin.u32 (!%p189_p3), %s2257_s20, %s239_s23 }
   0x8   : > { %s2329_s27 = sld [smem:[#allocation5]] (!%p189_p3)  ;;  %s241_s28 = sand.u32 (!%p189_p3), 1, %s1822_s26  }
   0x9   : > { %p247_p5 = scmp.eq.s32.totalorder (!%p189_p3), %s2257_s20, 0  ;;  %s242_s29 = ssub.s32 (!%p189_p3), 0, %s241_s28 }
   0xc   : > { %v2326_v0 = vld [vmem:[%s3320_s3] sm:$0x1]  ;;  %s3370_s29 = smov (!%p238_p4, %s242_s29), %s241_s28  ;;  %252 = sbr.rel (!%p247_p5) target bundleno = 24 (0x18), region = 40  ;;  %v265_v2 = vld [vmem:[%s3317_s0 + $0x8] sm:$0xff] (%p247_p5)  ;;  %v267_v3 = vld [vmem:[%s3317_s0 + $0x10] sm:$0xff] (%p247_p5) }
   0xd   : > { %s244_s30 = ssub.s32 1, %s3370_s29  ;;  %v263_v1 = vld [vmem:[%s3317_s0] sm:$0xff] (%p247_p5)  ;;  %v269_v4 = vld [vmem:[%s3317_s0 + $0x18] sm:$0xff] (%p247_p5)  ;;  %266 = vst [vmem:[#allocation2 + $0x8] sm:$0xff] (%p247_p5), %v265_v2  ;;  %v273_v6 = vld [vmem:[%s3317_s0 + $0x28] sm:$0xff] (%p247_p5) }
   0xe   : > { %264 = vst [vmem:[#allocation2] sm:$0xff] (%p247_p5), %v263_v1  ;;  %v271_v5 = vld [vmem:[%s3317_s0 + $0x20] sm:$0xff] (%p247_p5)  ;;  %v275_v7 = vld [vmem:[%s3317_s0 + $0x30] sm:$0xff] (%p247_p5)  ;;  %v277_v8 = vld [vmem:[%s3317_s0 + $0x38] sm:$0xff] (%p247_p5) }
   0xf   : > { %268 = vst [vmem:[#allocation2 + $0x10] sm:$0xff] (%p247_p5), %v267_v3 }
  0x10   : > { %270 = vst [vmem:[#allocation2 + $0x18] sm:$0xff] (%p247_p5), %v269_v4 }
  0x11   : > { %272 = vst [vmem:[#allocation2 + $0x20] sm:$0xff] %v271_v5 }
  0x12   : > { %274 = vst [vmem:[#allocation2 + $0x28] sm:$0xff] %v273_v6 }
  0x13   : > { %276 = vst [vmem:[#allocation2 + $0x30] sm:$0xff] %v275_v7 }
  0x14   : > { %278 = vst [vmem:[#allocation2 + $0x38] sm:$0xff] %v277_v8 }
  0x15   : > { %284 = vsyncadd [#allocation4], 1024 }
  0x16   : > { %2253 = dma.done.wait [#allocation4], 1024 }
  0x17   : > { %2254 = vsyncadd [#allocation4], 4294966272 }
  0x18 PF: > { %p1824_p6 = scmp.ne.s32.totalorder %s2257_s20, 0 }
  0x1a   : > { %291 = sbr.rel (%p1824_p6) target bundleno = 241 (0xf1), region = 63 }
  0x1f   : > { %v2360_v9 = vld [vmem:[#allocation2 + $0x10] sm:$0xff]   ;;  %v329_v10 = vperm.slane %v2326_v0, 0  ;;  %v2363_v11 = vld [vmem:[#allocation2 + $0x8] sm:$0xff]   ;;  %v2365_v12 = vld [vmem:[#allocation2] sm:$0xff]   ;;  %v2426_v50 = vstv %s2329_s27 }
  0x20   : > { %v1921_v13 = vunpack.c.l.bf16 %v2360_v9  ;;  %v1917_v14 = vunpack.c.l.bf16 %v2363_v11  ;;  %v1913_v15 = vunpack.c.l.bf16 %v2365_v12  ;;  %v1922_v19 = vunpack.c.h.bf16 %v2360_v9  ;;  %v2385_v25 = vld [vmem:[#allocation2 + $0x20] sm:$0xff]   ;;  %v2387_v26 = vld [vmem:[#allocation2 + $0x18] sm:$0xff]   ;;  %v2398_v33 = vld [vmem:[#allocation2 + $0x28] sm:$0xff]  }
  0x21   : > { %v1918_v20 = vunpack.c.h.bf16 %v2363_v11  ;;  %v1914_v21 = vunpack.c.h.bf16 %v2365_v12  ;;  %v1929_v27 = vunpack.c.l.bf16 %v2385_v25  ;;  %v1926_v28 = vunpack.c.h.bf16 %v2387_v26  ;;  %v2409_v40 = vld [vmem:[#allocation2 + $0x38] sm:$0xff]   ;;  %v2411_v41 = vld [vmem:[#allocation2 + $0x30] sm:$0xff]  }
  0x22   : > { %v335_v16 = vmul.f32 %v1921_v13, %v329_v10  ;;  %v333_v17 = vmul.f32 %v1917_v14, %v329_v10  ;;  %v331_v18 = vmul.f32 %v1913_v15, %v329_v10  ;;  %v336_v22 = vmul.f32 %v1922_v19, %v329_v10 }
  0x23   : > { %v334_v23 = vmul.f32 %v1918_v20, %v329_v10  ;;  %v332_v24 = vmul.f32 %v1914_v21, %v329_v10  ;;  %v1925_v29 = vunpack.c.l.bf16 %v2387_v26  ;;  %v339_v30 = vmul.f32 %v1929_v27, %v329_v10 }
  0x24   : > { %355 = vadd.xlane.f32.xlu2 %v335_v16  ;;  %351 = vadd.xlane.f32.xlu1 %v333_v17  ;;  %v338_v31 = vmul.f32 %v1926_v28, %v329_v10  ;;  %v1934_v34 = vunpack.c.h.bf16 %v2398_v33  ;;  %v1933_v35 = vunpack.c.l.bf16 %v2398_v33  ;;  %v1930_v36 = vunpack.c.h.bf16 %v2385_v25 }
  0x25   : > { %347 = vadd.xlane.f32.xlu0 %v331_v18  ;;  %v337_v32 = vmul.f32 %v1925_v29, %v329_v10  ;;  %v1941_v42 = vunpack.c.l.bf16 %v2409_v40  ;;  %v1938_v43 = vunpack.c.h.bf16 %v2411_v41  ;;  %v1937_v44 = vunpack.c.l.bf16 %v2411_v41 }
  0x26   : > { %v342_v37 = vmul.f32 %v1934_v34, %v329_v10  ;;  %v341_v38 = vmul.f32 %v1933_v35, %v329_v10  ;;  %v340_v39 = vmul.f32 %v1930_v36, %v329_v10  ;;  %v1942_v48 = vunpack.c.h.bf16 %v2409_v40 }
  0x27   : > { %v345_v45 = vmul.f32 %v1941_v42, %v329_v10  ;;  %v344_v46 = vmul.f32 %v1938_v43, %v329_v10  ;;  %v343_v47 = vmul.f32 %v1937_v44, %v329_v10 }
  0x28   : > { %v346_v49 = vmul.f32 %v1942_v48, %v329_v10 }
  0x2c   : > { %357 = vadd.xlane.f32.xlu2 %v336_v22  ;;  %353 = vadd.xlane.f32.xlu1 %v334_v23 }
  0x2d   : > { %349 = vadd.xlane.f32.xlu0 %v332_v24 }
  0x34   : > { %363 = vadd.xlane.f32.xlu2 %v339_v30  ;;  %361 = vadd.xlane.f32.xlu1 %v338_v31 }
  0x35   : > { %359 = vadd.xlane.f32.xlu0 %v337_v32 }
  0x3c   : > { %369 = vadd.xlane.f32.xlu2 %v342_v37  ;;  %367 = vadd.xlane.f32.xlu1 %v341_v38 }
  0x3d   : > { %365 = vadd.xlane.f32.xlu0 %v340_v39 }
  0x44   : > { %375 = vadd.xlane.f32.xlu2 %v345_v45  ;;  %373 = vadd.xlane.f32.xlu1 %v344_v46 }
  0x45   : > { %371 = vadd.xlane.f32.xlu0 %v343_v47 }
  0x4d   : > { %377 = vadd.xlane.f32.xlu0 %v346_v49 }
  0x97   : > { %v356_v51 = vpop.xlane.xlu2 %355  ;;  %v352_v52 = vpop.xlane.xlu1 %351 }
  0x98   : > { %v384_v53 = vadd.f32 %v2426_v50, %v356_v51  ;;  %v382_v54 = vadd.f32 %v2426_v50, %v352_v52  ;;  %v348_v55 = vpop.xlane.xlu0 %347 }
  0x99   : > { %v380_v56 = vadd.f32 %v2426_v50, %v348_v55 }
  0x9a   : > { %v1829_v57 = vmul.f32 -1.442695, %v384_v53  ;;  %v1827_v58 = vmul.f32 -1.442695, %v382_v54 }
  0x9b   : > { %v1825_v59 = vmul.f32 -1.442695, %v380_v56 }
  0x9c   : > { %2046 = vpow2.f32 %v1829_v57 }
  0x9d   : > { %2048 = vpow2.f32 %v1827_v58 }
  0x9e   : > { %2050 = vpow2.f32 %v1825_v59 }
  0x9f   : > { %v358_v60 = vpop.xlane.xlu2 %357  ;;  %v354_v61 = vpop.xlane.xlu1 %353 }
  0xa0   : > { %v385_v62 = vadd.f32 %v2426_v50, %v358_v60  ;;  %v383_v63 = vadd.f32 %v2426_v50, %v354_v61  ;;  %v350_v1 = vpop.xlane.xlu0 %349 }
  0xa1   : > { %v381_v2 = vadd.f32 %v2426_v50, %v350_v1 }
  0xa2   : > { %v2047_v3 = vpop.eup %2046  ;;  %v1830_v4 = vmul.f32 -1.442695, %v385_v62  ;;  %v1828_v7 = vmul.f32 -1.442695, %v383_v63 }
  0xa3   : > { %v2049_v5 = vpop.eup %2048  ;;  %v2434_v6 = vadd.f32 1.0, %v2047_v3  ;;  %v1826_v16 = vmul.f32 -1.442695, %v381_v2 }
  0xa4   : > { %v2051_v8 = vpop.eup %2050  ;;  %v2436_v10 = vadd.f32 1.0, %v2049_v5  ;;  %2052 = vpow2.f32 %v1830_v4 }
  0xa5   : > { %2054 = vrcp.f32 %v2434_v6  ;;  %v2440_v17 = vadd.f32 1.0, %v2051_v8  ;;  %v529_v23 = vand.u32 2147483647, %v2434_v6  ;;  %v531_v24 = vand.u32 2147483648, %v2434_v6 }
  0xa6   : > { %2056 = vrcp.f32 %v2436_v10  ;;  %v499_v31 = vand.u32 2147483647, %v2436_v10  ;;  %v501_v32 = vand.u32 2147483648, %v2436_v10  ;;  %vm525_vm0 = vweird.f32 %v2434_v6 }
  0xa7   : > { %2058 = vpow2.f32 %v1828_v7  ;;  %v364_v18 = vpop.xlane.xlu2 %363  ;;  %v362_v22 = vpop.xlane.xlu1 %361  ;;  %vm495_vm1 = vweird.f32 %v2436_v10  ;;  %v471_v46 = vand.u32 2147483648, %v2440_v17  ;;  %vm2455_vm2 = vcmp.eq.f32.partialorder %v529_v23, 8.507059e+37 }
  0xa8   : > { %2060 = vpow2.f32 %v1826_v16  ;;  %v388_v30 = vadd.f32 %v2426_v50, %v364_v18  ;;  %v387_v39 = vadd.f32 %v2426_v50, %v362_v22  ;;  %v532_v53 = vor.u32 1.1754944e-38, %v531_v24  ;;  %v360_v55 = vpop.xlane.xlu0 %359 }
  0xa9   : > { %2062 = vrcp.f32 %v2440_v17  ;;  %v469_v54 = vand.u32 2147483647, %v2440_v17  ;;  %vm2461_vm3 = vcmp.eq.f32.partialorder %v499_v31, 8.507059e+37  ;;  %v502_v59 = vor.u32 1.1754944e-38, %v501_v32 }
  0xaa   : > { %v2053_v37 = vpop.eup %2052  ;;  %v1833_v38 = vmul.f32 -1.442695, %v388_v30  ;;  %vm465_vm4 = vweird.f32 %v2440_v17  ;;  %v1832_v63 = vmul.f32 -1.442695, %v387_v39  ;;  %v472_v3 = vor.u32 1.1754944e-38, %v471_v46 }
  0xab   : > { %v2055_v45 = vpop.eup %2054  ;;  %v2452_v47 = vadd.f32 1.0, %v2053_v37  ;;  %v386_v5 = vadd.f32 %v2426_v50, %v360_v55  ;;  %vm2473_vm6 = vcmp.eq.f32.partialorder %v469_v54, 8.507059e+37 }
  0xac   : > { %v2057_v49 = vpop.eup %2056  ;;  %v521_v51 = vmul.f32 %v2055_v45, %v2434_v6  ;;  %vm526_vm5 = vweird.f32 %v2055_v45 }
  0xad   : > { %v2059_v56 = vpop.eup %2058  ;;  %v491_v57 = vmul.f32 %v2057_v49, %v2436_v10  ;;  %2064 = vrcp.f32 %v2452_v47  ;;  %v544_v18 = vand.u32 2147483647, %v2452_v47  ;;  %vm496_vm7 = vweird.f32 %v2057_v49  ;;  %vm527_vm9 = vmor %vm525_vm0, %vm526_vm5 }
  0xae   : > { %v2061_v60 = vpop.eup %2060  ;;  %v522_v61 = vsub.f32 1.0, %v521_v51  ;;  %v2467_v62 = vadd.f32 1.0, %v2059_v56  ;;  %2066 = vpow2.f32 %v1833_v38  ;;  %v546_v23 = vand.u32 2147483648, %v2452_v47  ;;  %vm497_vm11 = vmor %vm495_vm1, %vm496_vm7 }
  0xaf   : > { %v2063_v1 = vpop.eup %2062  ;;  %v492_v2 = vsub.f32 1.0, %v491_v57  ;;  %v2469_v4 = vadd.f32 1.0, %v2061_v60  ;;  %vm540_vm8 = vweird.f32 %v2452_v47  ;;  %v1831_v37 = vmul.f32 -1.442695, %v386_v5 }
  0xb0   : > { %v523_v7 = vmul.f32 %v2055_v45, %v522_v61  ;;  %v461_v8 = vmul.f32 %v2063_v1, %v2440_v17  ;;  %2068 = vrcp.f32 %v2467_v62  ;;  %vm466_vm10 = vweird.f32 %v2063_v1  ;;  %v2499_v61 = vpop.xlane.xlu0 %365 }
  0xb1   : > { %v493_v22 = vmul.f32 %v2057_v49, %v492_v2  ;;  %2070 = vpow2.f32 %v1832_v63  ;;  %vm2488_vm12 = vcmp.eq.f32.partialorder %v544_v18, 8.507059e+37  ;;  %v547_v56 = vor.u32 1.1754944e-38, %v546_v23  ;;  %vm467_vm14 = vmor %vm465_vm4, %vm466_vm10  ;;  %v370_v23 = vpop.xlane.xlu2 %369 }
  0xb2   : > { %v524_v24 = vadd.f32 %v2055_v45, %v523_v7  ;;  %v462_v30 = vsub.f32 1.0, %v461_v8  ;;  %2072 = vrcp.f32 %v2469_v4  ;;  %vm510_vm13 = vweird.f32 %v2467_v62 }
  0xb3   : > { %v2065_v31 = vpop.eup %2064  ;;  %v494_v32 = vadd.f32 %v2057_v49, %v493_v22  ;;  %v516_v52 = vand.u32 2147483648, %v2467_v62  ;;  %vm480_vm0 = vweird.f32 %v2469_v4  ;;  %v484_v17 = vand.u32 2147483647, %v2469_v4 }
  0xb4   : > { %v2067_v38 = vpop.eup %2066  ;;  %v528_v39 = vsel %vm527_vm9, %v2055_v45, %v524_v24  ;;  %v463_v46 = vmul.f32 %v2063_v1, %v462_v30  ;;  %v536_v51 = vmul.f32 %v2065_v31, %v2452_v47  ;;  %vm541_vm15 = vweird.f32 %v2065_v31  ;;  %v368_v24 = vpop.xlane.xlu1 %367 }
  0xb5   : > { %v533_v6 = vsel %vm2455_vm2, %v532_v53, %v528_v39  ;;  %v498_v55 = vsel %vm497_vm11, %v2057_v49, %v494_v32  ;;  %v514_v49 = vand.u32 2147483647, %v2467_v62  ;;  %vm542_vm1 = vmor %vm540_vm8, %vm541_vm15  ;;  %v486_v16 = vand.u32 2147483648, %v2469_v4 }
  0xb6   : > { %v704_v45 = vmul.f32 %v1921_v13, %v533_v6  ;;  %v503_v10 = vsel %vm2461_vm3, %v502_v59, %v498_v55  ;;  %v464_v57 = vadd.f32 %v2063_v1, %v463_v46  ;;  %v537_v60 = vsub.f32 1.0, %v536_v51  ;;  %v2069_v63 = vpop.eup %2068 }
  0xb7   : > { %v702_v2 = vmul.f32 %v1917_v14, %v503_v10  ;;  %v2508_v13 = vadd.f32 1.0, %v2067_v38  ;;  %v2071_v53 = vpop.eup %2070  ;;  %v506_v5 = vmul.f32 %v2069_v63, %v2467_v62  ;;  %vm511_vm2 = vweird.f32 %v2069_v63 }
  0xb8   : > { %721 = vst [vmem:[#allocation3 + $0x50] sm:$0xff] %v704_v45  ;;  %v468_v58 = vsel %vm467_vm14, %v2063_v1, %v464_v57  ;;  %v538_v59 = vmul.f32 %v2065_v31, %v537_v60  ;;  %v2073_v7 = vpop.eup %2072  ;;  %vm2521_vm3 = vcmp.eq.f32.partialorder %v514_v49, 8.507059e+37  ;;  %v2526_v30 = vadd.f32 1.0, %v2071_v53  ;;  %vm512_vm5 = vmor %vm510_vm13, %vm511_vm2  ;;  %v372_v57 = vpop.xlane.xlu0 %371 }
  0xb9   : > { %719 = vst [vmem:[#allocation3 + $0x58] sm:$0xff] %v702_v2  ;;  %v473_v14 = vsel %vm2473_vm6, %v472_v3, %v468_v58  ;;  %2074 = vrcp.f32 %v2508_v13  ;;  %v507_v1 = vsub.f32 1.0, %v506_v5  ;;  %v476_v22 = vmul.f32 %v2073_v7, %v2469_v4 }
  0xba   : > { %v700_v8 = vmul.f32 %v1913_v15, %v473_v14  ;;  %v539_v18 = vadd.f32 %v2065_v31, %v538_v59  ;;  %2076 = vpow2.f32 %v1831_v37  ;;  %v517_v46 = vor.u32 1.1754944e-38, %v516_v52 }
  0xbb   : > { %v508_v32 = vmul.f32 %v2069_v63, %v507_v1  ;;  %v477_v38 = vsub.f32 1.0, %v476_v22  ;;  %v589_v47 = vand.u32 2147483647, %v2508_v13  ;;  %2078 = vrcp.f32 %v2526_v30 }
  0xbc   : > { %717 = vst [vmem:[#allocation3 + $0x30] sm:$0xff] %v700_v8  ;;  %v543_v15 = vsel %vm542_vm1, %v2065_v31, %v539_v18  ;;  %vm481_vm4 = vweird.f32 %v2073_v7  ;;  %vm2537_vm6 = vcmp.eq.f32.partialorder %v484_v17, 8.507059e+37  ;;  %v487_v37 = vor.u32 1.1754944e-38, %v486_v16 }
  0xbd   : > { %v548_v39 = vsel %vm2488_vm12, %v547_v56, %v543_v15  ;;  %v509_v6 = vadd.f32 %v2069_v63, %v508_v32  ;;  %v478_v55 = vmul.f32 %v2073_v7, %v477_v38  ;;  %v391_v54 = vadd.f32 %v2426_v50, %v370_v23  ;;  %vm482_vm8 = vmor %vm480_vm0, %vm481_vm4 }
  0xbe   : > { %v705_v51 = vmul.f32 %v1922_v19, %v548_v39  ;;  %v390_v56 = vadd.f32 %v2426_v50, %v368_v24  ;;  %vm585_vm7 = vweird.f32 %v2508_v13  ;;  %vm2549_vm9 = vcmp.eq.f32.partialorder %v589_v47, 8.507059e+37 }
  0xbf   : > { %v2075_v45 = vpop.eup %2074  ;;  %v513_v9 = vsel %vm512_vm5, %v2069_v63, %v509_v6  ;;  %v479_v19 = vadd.f32 %v2073_v7, %v478_v55  ;;  %v591_v2 = vand.u32 2147483648, %v2508_v13  ;;  %v1836_v49 = vmul.f32 -1.442695, %v391_v54 }
  0xc0   : > { %722 = vst [vmem:[#allocation3 + $0x68] sm:$0xff] %v705_v51  ;;  %v581_v10 = vmul.f32 %v2075_v45, %v2508_v13  ;;  %v518_v62 = vsel %vm2521_vm3, %v517_v46, %v513_v9  ;;  %v2077_v63 = vpop.eup %2076  ;;  %v1835_v59 = vmul.f32 -1.442695, %v390_v56  ;;  %v389_v17 = vadd.f32 %v2426_v50, %v2499_v61  ;;  %v378_v55 = vpop.xlane.xlu0 %377 }
  0xc1   : > { %v703_v52 = vmul.f32 %v1918_v20, %v518_v62  ;;  %v483_v53 = vsel %vm482_vm8, %v2073_v7, %v479_v19  ;;  %v2079_v5 = vpop.eup %2078  ;;  %v2558_v4 = vadd.f32 1.0, %v2077_v63  ;;  %2080 = vpow2.f32 %v1836_v49  ;;  %v376_v20 = vpop.xlane.xlu2 %375 }
  0xc2   : > { %v582_v58 = vsub.f32 1.0, %v581_v10  ;;  %v488_v14 = vsel %vm2537_vm6, %v487_v37, %v483_v53  ;;  %vm586_vm10 = vweird.f32 %v2075_v45  ;;  %v566_v11 = vmul.f32 %v2079_v5, %v2526_v30  ;;  %v374_v7 = vpop.xlane.xlu1 %373 }
  0xc3   : > { %720 = vst [vmem:[#allocation3 + $0x18] sm:$0xff] %v703_v52  ;;  %v701_v8 = vmul.f32 %v1914_v21, %v488_v14  ;;  %v592_v1 = vor.u32 1.1754944e-38, %v591_v2  ;;  %vm570_vm11 = vweird.f32 %v2526_v30  ;;  %v574_v22 = vand.u32 2147483647, %v2526_v30  ;;  %vm587_vm12 = vmor %vm585_vm7, %vm586_vm10 }
  0xc4   : > { %v583_v18 = vmul.f32 %v2075_v45, %v582_v58  ;;  %2082 = vrcp.f32 %v2558_v4  ;;  %v567_v61 = vsub.f32 1.0, %v566_v11  ;;  %v1834_v24 = vmul.f32 -1.442695, %v389_v17 }
  0xc5   : > { %718 = vst [vmem:[#allocation3] sm:$0xff] %v701_v8  ;;  %2084 = vpow2.f32 %v1835_v59  ;;  %vm571_vm13 = vweird.f32 %v2079_v5  ;;  %v576_v12 = vand.u32 2147483648, %v2526_v30  ;;  %v394_v21 = vadd.f32 %v2426_v50, %v376_v20 }
  0xc6   : > { %v584_v23 = vadd.f32 %v2075_v45, %v583_v18  ;;  %v393_v3 = vadd.f32 %v2426_v50, %v374_v7  ;;  %v568_v15 = vmul.f32 %v2079_v5, %v567_v61  ;;  %2086 = vpow2.f32 %v1834_v24  ;;  %vm572_vm14 = vmor %vm570_vm11, %vm571_vm13 }
  0xc7   : > { %v392_v32 = vadd.f32 %v2426_v50, %v372_v57  ;;  %v2081_v38 = vpop.eup %2080  ;;  %v1839_v46 = vmul.f32 -1.442695, %v394_v21  ;;  %vm575_vm15 = vcmp.eq.f32.partialorder %v574_v22, 8.507059e+37  ;;  %v559_v19 = vand.u32 2147483647, %v2558_v4 }
  0xc8   : > { %v588_v16 = vsel %vm587_vm12, %v2075_v45, %v584_v23  ;;  %v569_v47 = vadd.f32 %v2079_v5, %v568_v15  ;;  %v2578_v51 = vadd.f32 1.0, %v2081_v38  ;;  %v1838_v6 = vmul.f32 -1.442695, %v393_v3 }
  0xc9   : > { %v593_v39 = vsel %vm2549_vm9, %v592_v1, %v588_v16  ;;  %v577_v45 = vor.u32 1.1754944e-38, %v576_v12  ;;  %2088 = vpow2.f32 %v1839_v46  ;;  %v1837_v37 = vmul.f32 -1.442695, %v392_v32 }
  0xca   : > { %v708_v13 = vmul.f32 %v1929_v27, %v593_v39  ;;  %v2083_v31 = vpop.eup %2082  ;;  %v573_v56 = vsel %vm572_vm14, %v2079_v5, %v569_v47  ;;  %2090 = vrcp.f32 %v2578_v51  ;;  %v395_v10 = vadd.f32 %v2426_v50, %v378_v55 }
  0xcb   : > { %v2085_v54 = vpop.eup %2084  ;;  %v551_v9 = vmul.f32 %v2083_v31, %v2558_v4  ;;  %v578_v27 = vsel %vm575_vm15, %v577_v45, %v573_v56  ;;  %2092 = vpow2.f32 %v1838_v6  ;;  %v561_v2 = vand.u32 2147483648, %v2558_v4 }
  0xcc   : > { %725 = vst [vmem:[#allocation3 + $0x40] sm:$0xff] %v708_v13  ;;  %v2087_v57 = vpop.eup %2086  ;;  %v707_v30 = vmul.f32 %v1926_v28, %v578_v27  ;;  %v2589_v60 = vadd.f32 1.0, %v2085_v54  ;;  %v634_v49 = vand.u32 2147483647, %v2578_v51  ;;  %2094 = vpow2.f32 %v1837_v37 }
  0xcd   : > { %v552_v62 = vsub.f32 1.0, %v551_v9  ;;  %v2593_v63 = vadd.f32 1.0, %v2087_v57  ;;  %vm556_vm0 = vweird.f32 %v2083_v31  ;;  %v636_v50 = vand.u32 2147483648, %v2578_v51 }
  0xce   : > { %724 = vst [vmem:[#allocation3 + $0x48] sm:$0xff] %v707_v30  ;;  %2096 = vrcp.f32 %v2589_v60  ;;  %vm555_vm1 = vweird.f32 %v2558_v4  ;;  %vm560_vm2 = vcmp.eq.f32.partialorder %v559_v19, 8.507059e+37  ;;  %v1840_v5 = vmul.f32 -1.442695, %v395_v10 }
  0xcf   : > { %v553_v52 = vmul.f32 %v2083_v31, %v552_v62  ;;  %v2089_v53 = vpop.eup %2088  ;;  %2098 = vrcp.f32 %v2593_v63  ;;  %vm557_vm3 = vmor %vm555_vm1, %vm556_vm0  ;;  %v562_v14 = vor.u32 1.1754944e-38, %v561_v2  ;;  %vm630_vm4 = vweird.f32 %v2578_v51 }
  0xd0   : > { %v2091_v28 = vpop.eup %2090  ;;  %v2599_v59 = vadd.f32 1.0, %v2089_v53  ;;  %vm2603_vm5 = vcmp.eq.f32.partialorder %v634_v49, 8.507059e+37  ;;  %v637_v11 = vor.u32 1.1754944e-38, %v636_v50  ;;  %v619_v20 = vand.u32 2147483647, %v2589_v60 }
  0xd1   : > { %v554_v58 = vadd.f32 %v2083_v31, %v553_v52  ;;  %v626_v17 = vmul.f32 %v2091_v28, %v2578_v51  ;;  %v2093_v18 = vpop.eup %2092  ;;  %v621_v23 = vand.u32 2147483648, %v2589_v60  ;;  %v604_v61 = vand.u32 2147483647, %v2593_v63 }
  0xd2   : > { %2100 = vrcp.f32 %v2599_v59  ;;  %v2095_v7 = vpop.eup %2094  ;;  %v2613_v21 = vadd.f32 1.0, %v2093_v18  ;;  %vm631_vm6 = vweird.f32 %v2091_v28  ;;  %vm615_vm7 = vweird.f32 %v2589_v60 }
  0xd3   : > { %v558_v4 = vsel %vm557_vm3, %v2083_v31, %v554_v58  ;;  %v627_v22 = vsub.f32 1.0, %v626_v17  ;;  %v2615_v3 = vadd.f32 1.0, %v2095_v7  ;;  %2102 = vpow2.f32 %v1840_v5  ;;  %vm632_vm10 = vmor %vm630_vm4, %vm631_vm6 }
  0xd4   : > { %v563_v1 = vsel %vm560_vm2, %v562_v14, %v558_v4  ;;  %v2097_v24 = vpop.eup %2096  ;;  %vm2619_vm8 = vcmp.eq.f32.partialorder %v619_v20, 8.507059e+37  ;;  %vm600_vm9 = vweird.f32 %v2593_v63  ;;  %2104 = vrcp.f32 %v2613_v21 }
  0xd5   : > { %v706_v12 = vmul.f32 %v1925_v29, %v563_v1  ;;  %v2099_v16 = vpop.eup %2098  ;;  %v628_v15 = vmul.f32 %v2091_v28, %v627_v22  ;;  %v611_v32 = vmul.f32 %v2097_v24, %v2589_v60  ;;  %v622_v46 = vor.u32 1.1754944e-38, %v621_v23 }
  0xd6   : > { %v596_v26 = vmul.f32 %v2099_v16, %v2593_v63  ;;  %v606_v13 = vand.u32 2147483648, %v2593_v63  ;;  %vm2629_vm11 = vcmp.eq.f32.partialorder %v604_v61, 8.507059e+37  ;;  %v679_v31 = vand.u32 2147483647, %v2599_v59 }
  0xd7   : > { %723 = vst [vmem:[#allocation3 + $0x8] sm:$0xff] %v706_v12  ;;  %v629_v29 = vadd.f32 %v2091_v28, %v628_v15  ;;  %v612_v39 = vsub.f32 1.0, %v611_v32  ;;  %2106 = vrcp.f32 %v2615_v3  ;;  %vm616_vm12 = vweird.f32 %v2097_v24 }
  0xd8   : > { %v2101_v47 = vpop.eup %2100  ;;  %v597_v6 = vsub.f32 1.0, %v596_v26  ;;  %vm601_vm13 = vweird.f32 %v2099_v16  ;;  %v681_v27 = vand.u32 2147483648, %v2599_v59  ;;  %v607_v57 = vor.u32 1.1754944e-38, %v606_v13  ;;  %vm617_vm14 = vmor %vm615_vm7, %vm616_vm12 }
  0xd9   : > { %v633_v45 = vsel %vm632_vm10, %v2091_v28, %v629_v29  ;;  %v613_v37 = vmul.f32 %v2097_v24, %v612_v39  ;;  %v671_v54 = vmul.f32 %v2101_v47, %v2599_v59  ;;  %v2103_v56 = vpop.eup %2102  ;;  %vm675_vm15 = vweird.f32 %v2599_v59  ;;  %vm602_vm1 = vmor %vm600_vm9, %vm601_vm13 }
  0xda   : > { %v638_v9 = vsel %vm2603_vm5, %v637_v11, %v633_v45  ;;  %v598_v51 = vmul.f32 %v2099_v16, %v597_v6  ;;  %v2105_v62 = vpop.eup %2104  ;;  %vm2644_vm0 = vcmp.eq.f32.partialorder %v679_v31, 8.507059e+37  ;;  %v2648_v52 = vadd.f32 1.0, %v2103_v56 }
  0xdb   : > { %v711_v19 = vmul.f32 %v1934_v34, %v638_v9  ;;  %v614_v10 = vadd.f32 %v2097_v24, %v613_v37  ;;  %v672_v30 = vsub.f32 1.0, %v671_v54  ;;  %vm676_vm2 = vweird.f32 %v2101_v47 }
  0xdc   : > { %v599_v2 = vadd.f32 %v2099_v16, %v598_v51  ;;  %v656_v53 = vmul.f32 %v2105_v62, %v2613_v21  ;;  %v682_v5 = vor.u32 1.1754944e-38, %v681_v27  ;;  %vm660_vm3 = vweird.f32 %v2613_v21  ;;  %vm677_vm4 = vmor %vm675_vm15, %vm676_vm2 }
  0xdd   : > { %728 = vst [vmem:[#allocation3 + $0x38] sm:$0xff] %v711_v19  ;;  %v618_v50 = vsel %vm617_vm14, %v2097_v24, %v614_v10  ;;  %v673_v34 = vmul.f32 %v2101_v47, %v672_v30  ;;  %v2107_v60 = vpop.eup %2106  ;;  %v666_v4 = vand.u32 2147483648, %v2613_v21  ;;  %2108 = vrcp.f32 %v2648_v52 }
  0xde   : > { %v623_v28 = vsel %vm2619_vm8, %v622_v46, %v618_v50  ;;  %v603_v58 = vsel %vm602_vm1, %v2099_v16, %v599_v2  ;;  %v657_v8 = vsub.f32 1.0, %v656_v53  ;;  %v641_v11 = vmul.f32 %v2107_v60, %v2615_v3 }
  0xdf   : > { %v710_v14 = vmul.f32 %v1933_v35, %v623_v28  ;;  %v608_v17 = vsel %vm2629_vm11, %v607_v57, %v603_v58  ;;  %v674_v63 = vadd.f32 %v2101_v47, %v673_v34  ;;  %vm661_vm5 = vweird.f32 %v2105_v62 }
  0xe0   : > { %v709_v18 = vmul.f32 %v1930_v36, %v608_v17  ;;  %v658_v35 = vmul.f32 %v2105_v62, %v657_v8  ;;  %v664_v20 = vand.u32 2147483647, %v2613_v21  ;;  %v642_v36 = vsub.f32 1.0, %v641_v11  ;;  %vm662_vm6 = vmor %vm660_vm3, %vm661_vm5 }
  0xe1   : > { %727 = vst [vmem:[#allocation3 + $0x10] sm:$0xff] %v710_v14  ;;  %v678_v33 = vsel %vm677_vm4, %v2101_v47, %v674_v63  ;;  %v651_v1 = vand.u32 2147483648, %v2615_v3  ;;  %v667_v22 = vor.u32 1.1754944e-38, %v666_v4  ;;  %vm646_vm7 = vweird.f32 %v2107_v60 }
  0xe2   : > { %726 = vst [vmem:[#allocation3 + $0x20] sm:$0xff] %v709_v18  ;;  %v683_v25 = vsel %vm2644_vm0, %v682_v5, %v678_v33  ;;  %v659_v7 = vadd.f32 %v2105_v62, %v658_v35  ;;  %v643_v23 = vmul.f32 %v2107_v60, %v642_v36  ;;  %v649_v61 = vand.u32 2147483647, %v2615_v3 }
  0xe3   : > { %v714_v59 = vmul.f32 %v1941_v42, %v683_v25  ;;  %vm665_vm8 = vcmp.eq.f32.partialorder %v664_v20, 8.507059e+37  ;;  %v2109_v12 = vpop.eup %2108  ;;  %vm645_vm9 = vweird.f32 %v2615_v3  ;;  %v652_v32 = vor.u32 1.1754944e-38, %v651_v1 }
  0xe4   : > { %v663_v24 = vsel %vm662_vm6, %v2105_v62, %v659_v7  ;;  %v644_v15 = vadd.f32 %v2107_v60, %v643_v23  ;;  %vm647_vm10 = vmor %vm645_vm9, %vm646_vm7  ;;  %v686_v21 = vmul.f32 %v2109_v12, %v2648_v52  ;;  %vm650_vm11 = vcmp.eq.f32.partialorder %v649_v61, 8.507059e+37 }
  0xe5   : > { %731 = vst [vmem:[#allocation3 + $0x78] sm:$0xff] %v714_v59  ;;  %v668_v16 = vsel %vm665_vm8, %v667_v22, %v663_v24  ;;  %v696_v46 = vand.u32 2147483648, %v2648_v52  ;;  %vm691_vm12 = vweird.f32 %v2109_v12  ;;  %v694_v3 = vand.u32 2147483647, %v2648_v52 }
  0xe6   : > { %v713_v42 = vmul.f32 %v1938_v43, %v668_v16  ;;  %v648_v38 = vsel %vm647_vm10, %v2107_v60, %v644_v15  ;;  %v687_v29 = vsub.f32 1.0, %v686_v21  ;;  %vm690_vm13 = vweird.f32 %v2648_v52 }
  0xe7   : > { %v653_v26 = vsel %vm650_vm11, %v652_v32, %v648_v38  ;;  %vm692_vm14 = vmor %vm690_vm13, %vm691_vm12  ;;  %v697_v47 = vor.u32 1.1754944e-38, %v696_v46  ;;  %vm695_vm15 = vcmp.eq.f32.partialorder %v694_v3, 8.507059e+37 }
  0xe8   : > { %730 = vst [vmem:[#allocation3 + $0x70] sm:$0xff] %v713_v42  ;;  %v712_v39 = vmul.f32 %v1937_v44, %v653_v26  ;;  %v688_v13 = vmul.f32 %v2109_v12, %v687_v29 }
  0xea   : > { %729 = vst [vmem:[#allocation3 + $0x60] sm:$0xff] %v712_v39  ;;  %v689_v43 = vadd.f32 %v2109_v12, %v688_v13 }
  0xec   : > { %v693_v6 = vsel %vm692_vm14, %v2109_v12, %v689_v43 }
  0xed   : > { %v698_v55 = vsel %vm695_vm15, %v697_v47, %v693_v6 }
  0xee   : > { %v715_v31 = vmul.f32 %v1942_v48, %v698_v55 }
  0xf0   : > { %732 = vst [vmem:[#allocation3 + $0x28] sm:$0xff] %v715_v31 }
  0xf1 PF: > { %v893_v41 = vld [vmem:[%s3319_s2] sm:$0xff]  ;;  %s1901_s28 = sshll.u32 %s3370_s29, 6  ;;  %v2267_v44 = vmov 0   ;;  %v895_v45 = vld [vmem:[%s3319_s2 + $0x10] sm:$0xff]  ;;  %v894_v54 = vld [vmem:[%s3319_s2 + $0x8] sm:$0xff]  ;;  %p1891_p7 = scmp.ge.s32.totalorder %s2257_s20, 3 }
  0xf2   : > { %2110 = vset.pattern.permute.xlu0 %v2267_v44  ;;  %2111 = vset.pattern.permute.xlu1 %v2267_v44  ;;  %s2694_s8 = scalar_lea.vmem [#allocation2], %s1901_s28  ;;  %v897_v48 = vld [vmem:[%s3319_s2 + $0x20] sm:$0xff]  ;;  %v896_v56 = vld [vmem:[%s3319_s2 + $0x18] sm:$0xff]  ;;  %v898_v51 = vld [vmem:[%s3319_s2 + $0x28] sm:$0xff] }
  0xf3   : > { %911 = vperm.xlu0 %2110, %v893_v41   ;;  %v1909_v40 = vld [vmem:[%s2694_s8 + $0x38] sm:$0xff]  ;;  %921 = vperm.xlu1 %2111, %v895_v45   ;;  %v1908_v37 = vld [vmem:[%s2694_s8 + $0x30] sm:$0xff]  ;;  %v1907_v9 = vld [vmem:[%s2694_s8 + $0x28] sm:$0xff] }
  0xf4   : > { %2112 = vset.pattern.permute.xlu2 %v2267_v44  ;;  %844 = vmatpush.bf16.msra.mxu0 %v1909_v40  ;;  %v1906_v27 = vld [vmem:[%s2694_s8 + $0x20] sm:$0xff]  ;;  %v899_v19 = vld [vmem:[%s3319_s2 + $0x30] sm:$0xff]  ;;  %v900_v10 = vld [vmem:[%s3319_s2 + $0x38] sm:$0xff] }
  0xf5   : > { %1997 = vmatpush.bf16.msra.mxu1 %v1909_v40  ;;  %1998 = vmatpush.bf16.msra.mxu2 %v1909_v40  ;;  %v1905_v57 = vld [vmem:[%s2694_s8 + $0x18] sm:$0xff]  ;;  %v901_v30 = vld [vmem:[%s3319_s2 + $0x40] sm:$0xff]  ;;  %v1904_v62 = vld [vmem:[%s2694_s8 + $0x10] sm:$0xff] }
  0xf6   : > { %1999 = vmatpush.bf16.msra.mxu3 %v1909_v40  ;;  %931 = vperm.xlu2 %2112, %v897_v48   ;;  %v2726_v2 = vld [vmem:[%s3318_s1] sm:$0xff]  ;;  %v2731_v49 = vld [vmem:[%s3318_s1 + $0x8] sm:$0xff]  ;;  %v2736_v52 = vld [vmem:[%s3318_s1 + $0x10] sm:$0xff] }
  0xf7   : > { %v2741_v50 = vld [vmem:[%s3318_s1 + $0x18] sm:$0xff]  ;;  %v902_v34 = vld [vmem:[%s3319_s2 + $0x48] sm:$0xff]  ;;  %v737_v53 = vunpack.c.0.s8 %v2726_v2  ;;  %v738_v60 = vunpack.c.1.s8 %v2726_v2  ;;  %v741_v28 = vunpack.c.0.s8 %v2731_v49  ;;  %v742_v58 = vunpack.c.1.s8 %v2731_v49  ;;  %v903_v5 = vld [vmem:[%s3319_s2 + $0x50] sm:$0xff] }
  0xf8   : > { %845 = vmatpush.bf16.msra.mxu0 %v1908_v37  ;;  %v1903_v14 = vld [vmem:[%s2694_s8 + $0x8] sm:$0xff]  ;;  %v745_v17 = vunpack.c.0.s8 %v2736_v52  ;;  %v746_v63 = vunpack.c.1.s8 %v2736_v52  ;;  %v749_v8 = vunpack.c.0.s8 %v2741_v50  ;;  %v750_v18 = vunpack.c.1.s8 %v2741_v50  ;;  %v904_v20 = vld [vmem:[%s3319_s2 + $0x58] sm:$0xff]  ;;  %v1902_v25 = vld [vmem:[%s2694_s8] sm:$0xff] }
  0xf9   : > { %2000 = vmatpush.bf16.msra.mxu1 %v1908_v37  ;;  %2001 = vmatpush.bf16.msra.mxu2 %v1908_v37  ;;  %v753_v4 = vcvt.s32.f32 %v737_v53  ;;  %v754_v11 = vcvt.s32.f32 %v738_v60  ;;  %v757_v33 = vcvt.s32.f32 %v741_v28  ;;  %v758_v35 = vcvt.s32.f32 %v742_v58  ;;  %v905_v22 = vld [vmem:[%s3319_s2 + $0x60] sm:$0xff]  ;;  %v906_v24 = vld [vmem:[%s3319_s2 + $0x68] sm:$0xff]  ;;  %v907_v15 = vld [vmem:[%s3319_s2 + $0x70] sm:$0xff] }
  0xfa   : > { %2002 = vmatpush.bf16.msra.mxu3 %v1908_v37  ;;  %v761_v36 = vcvt.s32.f32 %v745_v17  ;;  %v762_v59 = vcvt.s32.f32 %v746_v63  ;;  %v765_v7 = vcvt.s32.f32 %v749_v8  ;;  %v766_v1 = vcvt.s32.f32 %v750_v18  ;;  %v908_v42 = vld [vmem:[%s3319_s2 + $0x78] sm:$0xff] }
  0xfb   : > { %916 = vperm.xlu0 %2110, %v894_v54   ;;  %926 = vperm.xlu1 %2111, %v896_v56   ;;  %v769_v23 = vpack.c.bf16 %v754_v11, %v753_v4  ;;  %v771_v61 = vpack.c.bf16 %v758_v35, %v757_v33  ;;  %v739_v32 = vunpack.c.2.s8 %v2726_v2  ;;  %v740_v21 = vunpack.c.3.s8 %v2726_v2 }
  0xfc   : > { %846 = vmatpush.bf16.msra.mxu0 %v1907_v9  ;;  %v773_v12 = vpack.c.bf16 %v762_v59, %v761_v36  ;;  %v775_v16 = vpack.c.bf16 %v766_v1, %v765_v7  ;;  %v743_v38 = vunpack.c.2.s8 %v2731_v49  ;;  %v744_v26 = vunpack.c.3.s8 %v2731_v49 }
  0xfd   : > { %2003 = vmatpush.bf16.msra.mxu1 %v1907_v9  ;;  %2004 = vmatpush.bf16.msra.mxu2 %v1907_v9  ;;  %v747_v29 = vunpack.c.2.s8 %v2736_v52  ;;  %v748_v39 = vunpack.c.3.s8 %v2736_v52  ;;  %v751_v46 = vunpack.c.2.s8 %v2741_v50  ;;  %v752_v13 = vunpack.c.3.s8 %v2741_v50 }
  0xfe   : > { %2005 = vmatpush.bf16.msra.mxu3 %v1907_v9  ;;  %936 = vperm.xlu2 %2112, %v898_v51   ;;  %v755_v3 = vcvt.s32.f32 %v739_v32  ;;  %v756_v43 = vcvt.s32.f32 %v740_v21  ;;  %v759_v47 = vcvt.s32.f32 %v743_v38  ;;  %v760_v6 = vcvt.s32.f32 %v744_v26 }
  0xff   : > { %v763_v55 = vcvt.s32.f32 %v747_v29  ;;  %v764_v31 = vcvt.s32.f32 %v748_v39  ;;  %v767_v41 = vcvt.s32.f32 %v751_v46  ;;  %v768_v44 = vcvt.s32.f32 %v752_v13 }
 0x100   : > { %847 = vmatpush.bf16.msra.mxu0 %v1906_v27  ;;  %v770_v45 = vpack.c.bf16 %v756_v43, %v755_v3  ;;  %v772_v40 = vpack.c.bf16 %v760_v6, %v759_v47 }
 0x101   : > { %2006 = vmatpush.bf16.msra.mxu1 %v1906_v27  ;;  %2007 = vmatpush.bf16.msra.mxu2 %v1906_v27  ;;  %v774_v48 = vpack.c.bf16 %v764_v31, %v763_v55  ;;  %v776_v37 = vpack.c.bf16 %v768_v44, %v767_v41 }
 0x102   : > { %2008 = vmatpush.bf16.msra.mxu3 %v1906_v27 }
 0x103   : > { %941 = vperm.xlu0 %2110, %v899_v19   ;;  %946 = vperm.xlu1 %2111, %v900_v10  }
 0x104   : > { %848 = vmatpush.bf16.msra.mxu0 %v1905_v57 }
 0x105   : > { %2009 = vmatpush.bf16.msra.mxu1 %v1905_v57  ;;  %2010 = vmatpush.bf16.msra.mxu2 %v1905_v57 }
 0x106   : > { %2011 = vmatpush.bf16.msra.mxu3 %v1905_v57  ;;  %951 = vperm.xlu2 %2112, %v901_v30   ;;  %v2783_v57 = vperm.slane %v2326_v0, 0 }
 0x108   : > { %849 = vmatpush.bf16.msra.mxu0 %v1904_v62 }
 0x109   : > { %2012 = vmatpush.bf16.msra.mxu1 %v1904_v62  ;;  %2013 = vmatpush.bf16.msra.mxu2 %v1904_v62 }
 0x10a   : > { %2014 = vmatpush.bf16.msra.mxu3 %v1904_v62 }
 0x10b   : > { %956 = vperm.xlu0 %2110, %v902_v34   ;;  %961 = vperm.xlu1 %2111, %v903_v5  }
 0x10c   : > { %850 = vmatpush.bf16.msra.mxu0 %v1903_v14 }
 0x10d   : > { %2015 = vmatpush.bf16.msra.mxu1 %v1903_v14  ;;  %2016 = vmatpush.bf16.msra.mxu2 %v1903_v14 }
 0x10e   : > { %2017 = vmatpush.bf16.msra.mxu3 %v1903_v14  ;;  %966 = vperm.xlu2 %2112, %v904_v20  }
 0x110   : > { %851 = vmatpush.bf16.msra.mxu0 %v1902_v25 }
 0x111   : > { %2018 = vmatpush.bf16.msra.mxu1 %v1902_v25  ;;  %2019 = vmatpush.bf16.msra.mxu2 %v1902_v25 }
 0x112   : > { %2020 = vmatpush.bf16.msra.mxu3 %v1902_v25 }
 0x113   : > { %971 = vperm.xlu0 %2110, %v905_v22   ;;  %976 = vperm.xlu1 %2111, %v906_v24  }
 0x114   : > { %852 = vmatmul.bf16.vlgmr.msra.gmra.mxu0 %v769_v23  ;;  %862 = vmatmul.bf16.vlgmr.msra.gmra.mxu1 %v771_v61 }
 0x115   : > { %872 = vmatmul.bf16.vlgmr.msra.gmra.mxu2 %v773_v12  ;;  %882 = vmatmul.bf16.vlgmr.msra.gmra.mxu3 %v775_v16 }
 0x116   : > { %981 = vperm.xlu2 %2112, %v907_v15  }
 0x11b   : > { %986 = vperm.xlu0 %2110, %v908_v42  }
 0x124   : > { %857 = vmatmul.bf16.gmra.mxu0 %v770_v45  ;;  %867 = vmatmul.bf16.gmra.mxu1 %v772_v40 }
 0x125   : > { %877 = vmatmul.bf16.gmra.mxu2 %v774_v48  ;;  %887 = vmatmul.bf16.gmra.mxu3 %v776_v37 }
 0x150   : > { %v932_v9 = vpop.permute.xlu2 %931 }
 0x158   : > { %v937_v19 = vpop.permute.xlu2 %936 }
 0x160   : > { %v952_v50 = vpop.permute.xlu2 %951 }
 0x165   : > { %v912_v54 = vpop.permute.xlu0 %911  ;;  %v922_v27 = vpop.permute.xlu1 %921 }
 0x168   : > { %v967_v46 = vpop.permute.xlu2 %966 }
 0x16d   : > { %v917_v56 = vpop.permute.xlu0 %916  ;;  %v927_v49 = vpop.permute.xlu1 %926 }
 0x170   : > { %v982_v48 = vpop.permute.xlu2 %981 }
 0x175   : > { %v942_v51 = vpop.permute.xlu0 %941  ;;  %v947_v18 = vpop.permute.xlu1 %946 }
 0x17d   : > { %v957_v10 = vpop.permute.xlu0 %956  ;;  %v962_v1 = vpop.permute.xlu1 %961 }
 0x185   : > { %v972_v34 = vpop.permute.xlu0 %971  ;;  %v977_v47 = vpop.permute.xlu1 %976 }
 0x18d   : > { %v987_v6 = vpop.permute.xlu0 %986 }
 0x191   : > { %v853_v30 = vpop.f32.mrf.mxu0  ;;  %v863_v62 = vpop.f32.mrf.mxu1 }
 0x192   : > { %v2785_v2 = vmul.f32 %v912_v54, %v853_v30  ;;  %v2789_v53 = vmul.f32 %v932_v9, %v863_v62 }
 0x194   : > { %v1008_v52 = vmul.f32 %v2783_v57, %v2785_v2  ;;  %v1012_v8 = vmul.f32 %v2783_v57, %v2789_v53 }
 0x196   : > { %1024 = vadd.xlane.f32.xlu1 %v1008_v52 }
 0x198   : > { %v873_v60 = vpop.f32.mrf.mxu2  ;;  %v883_v28 = vpop.f32.mrf.mxu3 }
 0x199   : > { %v2791_v58 = vmul.f32 %v952_v50, %v873_v60  ;;  %v2793_v5 = vmul.f32 %v972_v34, %v883_v28  ;;  %v855_v0 = vpop.f32.mrf.mxu0  ;;  %v865_v14 = vpop.f32.mrf.mxu1 }
 0x19a   : > { %v2801_v4 = vmul.f32 %v917_v56, %v855_v0  ;;  %v2809_v7 = vmul.f32 %v937_v19, %v865_v14  ;;  %v2850_v56 = vstv %s2329_s27  ;;  %s1910_s27 = sshll.u32 (!%p1891_p7), %s244_s30, 6 }
 0x19b   : > { %v1020_v17 = vmul.f32 %v2783_v57, %v2793_v5  ;;  %v1016_v63 = vmul.f32 %v2783_v57, %v2791_v58  ;;  %s1467_s7 = scalar_lea.vmem (!%p1891_p7), [#allocation2], %s1910_s27 }
 0x19c   : > { %v1009_v59 = vmul.f32 %v2783_v57, %v2801_v4  ;;  %v1013_v16 = vmul.f32 %v2783_v57, %v2809_v7 }
 0x19d   : > { %1048 = vadd.xlane.f32.xlu0 %v1020_v17  ;;  %1040 = vadd.xlane.f32.xlu2 %v1016_v63 }
 0x19e   : > { %1032 = vadd.xlane.f32.xlu1 %v1012_v8 }
 0x1a0   : > { %v875_v11 = vpop.f32.mrf.mxu2  ;;  %v885_v35 = vpop.f32.mrf.mxu3 }
 0x1a1   : > { %v2803_v33 = vmul.f32 %v957_v10, %v875_v11  ;;  %v858_v20 = vpop.f32.mrf.mxu0  ;;  %v868_v25 = vpop.f32.mrf.mxu1  ;;  %v2833_v55 = vmul.f32 %v977_v47, %v885_v35 }
 0x1a2   : > { %v2811_v22 = vmul.f32 %v922_v27, %v858_v20  ;;  %v2825_v26 = vmul.f32 %v942_v51, %v868_v25 }
 0x1a3   : > { %v1017_v36 = vmul.f32 %v2783_v57, %v2803_v33  ;;  %v1021_v44 = vmul.f32 %v2783_v57, %v2833_v55 }
 0x1a4   : > { %v1010_v32 = vmul.f32 %v2783_v57, %v2811_v22  ;;  %v1014_v3 = vmul.f32 %v2783_v57, %v2825_v26 }
 0x1a5   : > { %1042 = vadd.xlane.f32.xlu0 %v1017_v36  ;;  %1026 = vadd.xlane.f32.xlu2 %v1009_v59 }
 0x1a8   : > { %v878_v23 = vpop.f32.mrf.mxu2  ;;  %v888_v24 = vpop.f32.mrf.mxu3 }
 0x1a9   : > { %v2813_v61 = vmul.f32 %v962_v1, %v878_v23  ;;  %v860_v15 = vpop.f32.mrf.mxu0  ;;  %v870_v42 = vpop.f32.mrf.mxu1  ;;  %v2845_v37 = vmul.f32 %v982_v48, %v888_v24 }
 0x1aa   : > { %v2821_v21 = vmul.f32 %v927_v49, %v860_v15  ;;  %v2823_v38 = vmul.f32 %v947_v18, %v870_v42 }
 0x1ab   : > { %v1018_v12 = vmul.f32 %v2783_v57, %v2813_v61  ;;  %v1022_v54 = vmul.f32 %v2783_v57, %v2845_v37 }
 0x1ac   : > { %v1015_v29 = vmul.f32 %v2783_v57, %v2823_v38  ;;  %v1011_v39 = vmul.f32 %v2783_v57, %v2821_v21 }
 0x1ad   : > { %1044 = vadd.xlane.f32.xlu1 %v1018_v12  ;;  %1034 = vadd.xlane.f32.xlu2 %v1013_v16 }
 0x1ae   : > { %1028 = vadd.xlane.f32.xlu0 %v1010_v32 }
 0x1b0   : > { %v880_v13 = vpop.f32.mrf.mxu2  ;;  %v890_v43 = vpop.f32.mrf.mxu3 }
 0x1b1   : > { %v2835_v31 = vmul.f32 %v967_v46, %v880_v13  ;;  %v2837_v41 = vmul.f32 %v987_v6, %v890_v43 }
 0x1b3   : > { %v1019_v45 = vmul.f32 %v2783_v57, %v2835_v31  ;;  %v1023_v40 = vmul.f32 %v2783_v57, %v2837_v41 }
 0x1b5   : > { %1038 = vadd.xlane.f32.xlu1 %v1015_v29  ;;  %1030 = vadd.xlane.f32.xlu2 %v1011_v39 }
 0x1b6   : > { %1036 = vadd.xlane.f32.xlu0 %v1014_v3 }
 0x1bd   : > { %1050 = vadd.xlane.f32.xlu1 %v1021_v44  ;;  %1046 = vadd.xlane.f32.xlu2 %v1019_v45 }
 0x1be   : > { %1054 = vadd.xlane.f32.xlu0 %v1023_v40 }
 0x1c5   : > { %1052 = vadd.xlane.f32.xlu2 %v1022_v54 }
 0x209   : > { %v1025_v9 = vpop.xlane.xlu1 %1024 }
 0x20a   : > { %v1057_v51 = vadd.f32 %v2850_v56, %v1025_v9 }
 0x20c   : > { %v1875_v27 = vmul.f32 -1.442695, %v1057_v51 }
 0x20e   : > { %2113 = vpow2.f32 %v1875_v27 }
 0x210   : > { %v1049_v19 = vpop.xlane.xlu0 %1048  ;;  %v1041_v10 = vpop.xlane.xlu2 %1040 }
 0x211   : > { %v1069_v30 = vadd.f32 %v2850_v56, %v1049_v19  ;;  %v1065_v62 = vadd.f32 %v2850_v56, %v1041_v10  ;;  %v1033_v49 = vpop.xlane.xlu1 %1032 }
 0x212   : > { %v1061_v52 = vadd.f32 %v2850_v56, %v1033_v49 }
 0x213   : > { %v1887_v50 = vmul.f32 -1.442695, %v1069_v30  ;;  %v1883_v34 = vmul.f32 -1.442695, %v1065_v62 }
 0x214   : > { %v2114_v57 = vpop.eup %2113  ;;  %v1879_v60 = vmul.f32 -1.442695, %v1061_v52 }
 0x215   : > { %v1121_v28 = vadd.f32 1.0, %v2114_v57  ;;  %2115 = vpow2.f32 %v1887_v50  ;;  %v1378_v57 = vld [vmem:[#allocation3 + $0x30] sm:$0xff] }
 0x216   : > { %2117 = vpow2.f32 %v1883_v34 }
 0x217   : > { %2119 = vrcp.f32 %v1121_v28  ;;  %v1146_v23 = vand.u32 2147483647, %v1121_v28  ;;  %v1148_v24 = vand.u32 2147483648, %v1121_v28  ;;  %vm1142_vm1 = vweird.f32 %v1121_v28 }
 0x218   : > { %2121 = vpow2.f32 %v1879_v60  ;;  %v1043_v0 = vpop.xlane.xlu0 %1042  ;;  %v1027_v14 = vpop.xlane.xlu2 %1026 }
 0x219   : > { %v1066_v17 = vadd.f32 %v2850_v56, %v1043_v0  ;;  %v1058_v63 = vadd.f32 %v2850_v56, %v1027_v14  ;;  %vm2872_vm2 = vcmp.eq.f32.partialorder %v1146_v23, 8.507059e+37  ;;  %v1149_v47 = vor.u32 1.1754944e-38, %v1148_v24 }
 0x21b   : > { %v2116_v8 = vpop.eup %2115  ;;  %v1884_v18 = vmul.f32 -1.442695, %v1066_v17  ;;  %v1876_v36 = vmul.f32 -1.442695, %v1058_v63 }
 0x21c   : > { %v2118_v11 = vpop.eup %2117  ;;  %v2858_v35 = vadd.f32 1.0, %v2116_v8 }
 0x21d   : > { %v2120_v20 = vpop.eup %2119  ;;  %v2860_v25 = vadd.f32 1.0, %v2118_v11  ;;  %2123 = vpow2.f32 %v1884_v18 }
 0x21e   : > { %v2122_v59 = vpop.eup %2121  ;;  %v1138_v1 = vmul.f32 %v2120_v20, %v1121_v28  ;;  %2125 = vrcp.f32 %v2858_v35  ;;  %v1328_v16 = vand.u32 2147483648, %v2858_v35  ;;  %vm1143_vm0 = vweird.f32 %v2120_v20 }
 0x21f   : > { %2127 = vrcp.f32 %v2860_v25  ;;  %v2865_v15 = vadd.f32 1.0, %v2122_v59  ;;  %v1326_v32 = vand.u32 2147483647, %v2858_v35  ;;  %v1268_v29 = vand.u32 2147483648, %v2860_v25  ;;  %vm1144_vm5 = vmor %vm1142_vm1, %vm1143_vm0 }
 0x220   : > { %v1139_v12 = vsub.f32 1.0, %v1138_v1  ;;  %v1045_v42 = vpop.xlane.xlu1 %1044  ;;  %2129 = vpow2.f32 %v1876_v36  ;;  %v1266_v46 = vand.u32 2147483647, %v2860_v25  ;;  %vm1322_vm3 = vweird.f32 %v2858_v35  ;;  %v1035_v48 = vpop.xlane.xlu2 %1034 }
 0x221   : > { %2131 = vrcp.f32 %v2865_v15  ;;  %v1067_v13 = vadd.f32 %v2850_v56, %v1045_v42  ;;  %v1329_v45 = vor.u32 1.1754944e-38, %v1328_v16  ;;  %vm1262_vm4 = vweird.f32 %v2860_v25  ;;  %v1029_v54 = vpop.xlane.xlu0 %1028 }
 0x222   : > { %v1140_v39 = vmul.f32 %v2120_v20, %v1139_v12  ;;  %vm2882_vm6 = vcmp.eq.f32.partialorder %v1326_v32, 8.507059e+37  ;;  %v1269_v19 = vor.u32 1.1754944e-38, %v1268_v29  ;;  %v1206_v10 = vand.u32 2147483647, %v2865_v15 }
 0x223   : > { %v2124_v3 = vpop.eup %2123  ;;  %v1208_v30 = vand.u32 2147483648, %v2865_v15  ;;  %vm2889_vm7 = vcmp.eq.f32.partialorder %v1266_v46, 8.507059e+37  ;;  %v1885_v50 = vmul.f32 -1.442695, %v1067_v13  ;;  %vm1202_vm8 = vweird.f32 %v2865_v15 }
 0x224   : > { %v2126_v6 = vpop.eup %2125  ;;  %v1141_v44 = vadd.f32 %v2120_v20, %v1140_v39  ;;  %v2878_v40 = vadd.f32 1.0, %v2124_v3  ;;  %v1062_v0 = vadd.f32 %v2850_v56, %v1035_v48  ;;  %v1059_v14 = vadd.f32 %v2850_v56, %v1029_v54 }
 0x225   : > { %v2128_v9 = vpop.eup %2127  ;;  %v1318_v51 = vmul.f32 %v2126_v6, %v2858_v35  ;;  %vm1323_vm9 = vweird.f32 %v2126_v6  ;;  %vm2903_vm11 = vcmp.eq.f32.partialorder %v1206_v10, 8.507059e+37  ;;  %v1209_v32 = vor.u32 1.1754944e-38, %v1208_v30 }
 0x226   : > { %v1145_v62 = vsel %vm1144_vm5, %v2120_v20, %v1141_v44  ;;  %v1258_v49 = vmul.f32 %v2128_v9, %v2860_v25  ;;  %2133 = vrcp.f32 %v2878_v40  ;;  %v2130_v34 = vpop.eup %2129  ;;  %vm1263_vm10 = vweird.f32 %v2128_v9  ;;  %vm1324_vm13 = vmor %vm1322_vm3, %vm1323_vm9  ;;  %v1390_v44 = vld [vmem:[#allocation3 + $0x60] sm:$0xff] }
 0x227   : > { %v1150_v60 = vsel %vm2872_vm2, %v1149_v47, %v1145_v62  ;;  %v1319_v28 = vsub.f32 1.0, %v1318_v51  ;;  %v2132_v17 = vpop.eup %2131  ;;  %v2900_v18 = vadd.f32 1.0, %v2130_v34  ;;  %v1281_v59 = vand.u32 2147483647, %v2878_v40  ;;  %vm1264_vm15 = vmor %vm1262_vm4, %vm1263_vm10  ;;  %v1386_v51 = vld [vmem:[#allocation3 + $0x40] sm:$0xff] }
 0x228   : > { %v1394_v63 = vmul.f32 %v1150_v60, %v2785_v2  ;;  %v1259_v8 = vsub.f32 1.0, %v1258_v49  ;;  %v1198_v20 = vmul.f32 %v2132_v17, %v2865_v15  ;;  %v1039_v1 = vpop.xlane.xlu1 %1038  ;;  %v1283_v12 = vand.u32 2147483648, %v2878_v40  ;;  %v1031_v15 = vpop.xlane.xlu2 %1030 }
 0x229   : > { %v1320_v11 = vmul.f32 %v2126_v6, %v1319_v28  ;;  %2135 = vrcp.f32 %v2900_v18  ;;  %vm1277_vm12 = vweird.f32 %v2878_v40  ;;  %vm1203_vm14 = vweird.f32 %v2132_v17  ;;  %v1037_v52 = vpop.xlane.xlu0 %1036  ;;  %v1382_v28 = vld [vmem:[#allocation3 + $0x50] sm:$0xff] }
 0x22a   : > { %v1410_v23 = vadd.f32 %v1394_v63, %v1378_v57  ;;  %v1260_v24 = vmul.f32 %v2128_v9, %v1259_v8  ;;  %v1199_v42 = vsub.f32 1.0, %v1198_v20  ;;  %2137 = vpow2.f32 %v1885_v50  ;;  %vm1204_vm2 = vmor %vm1202_vm8, %vm1203_vm14 }
 0x22b   : > { %v1321_v16 = vadd.f32 %v2126_v6, %v1320_v11  ;;  %v1880_v46 = vmul.f32 -1.442695, %v1062_v0  ;;  %vm2918_vm0 = vcmp.eq.f32.partialorder %v1281_v59, 8.507059e+37  ;;  %v1284_v54 = vor.u32 1.1754944e-38, %v1283_v12 }
 0x22c   : > { %v2134_v29 = vpop.eup %2133  ;;  %1426 = vst [vmem:[#allocation3 + $0x30] sm:$0xff] %v1410_v23  ;;  %v1261_v39 = vadd.f32 %v2128_v9, %v1260_v24  ;;  %v1200_v3 = vmul.f32 %v2132_v17, %v1199_v42  ;;  %v1161_v63 = vand.u32 2147483647, %v2900_v18  ;;  %v1163_v36 = vand.u32 2147483648, %v2900_v18  ;;  %v1387_v42 = vld [vmem:[#allocation3 + $0x20] sm:$0xff] }
 0x22d   : > { %v1325_v13 = vsel %vm1324_vm13, %v2126_v6, %v1321_v16  ;;  %v1273_v43 = vmul.f32 %v2134_v29, %v2878_v40  ;;  %vm1278_vm1 = vweird.f32 %v2134_v29  ;;  %2139 = vpow2.f32 %v1880_v46 }
 0x22e   : > { %v1330_v35 = vsel %vm2882_vm6, %v1329_v45, %v1325_v13  ;;  %v1265_v48 = vsel %vm1264_vm15, %v2128_v9, %v1261_v39  ;;  %v1201_v10 = vadd.f32 %v2132_v17, %v1200_v3  ;;  %v1877_v45 = vmul.f32 -1.442695, %v1059_v14  ;;  %vm1279_vm3 = vmor %vm1277_vm12, %vm1278_vm1 }
 0x22f   : > { %v1406_v6 = vmul.f32 %v1330_v35, %v2793_v5  ;;  %v1270_v25 = vsel %vm2889_vm7, %v1269_v19, %v1265_v48  ;;  %v1274_v30 = vsub.f32 1.0, %v1273_v43  ;;  %v2136_v62 = vpop.eup %2135  ;;  %v1064_v9 = vadd.f32 %v2850_v56, %v1039_v1  ;;  %v1379_v48 = vld [vmem:[#allocation3] sm:$0xff] }
 0x230   : > { %v1402_v49 = vmul.f32 %v1270_v25, %v2791_v58  ;;  %v1205_v50 = vsel %vm1204_vm2, %v2132_v17, %v1201_v10  ;;  %v1153_v57 = vmul.f32 %v2136_v62, %v2900_v18  ;;  %v2138_v19 = vpop.eup %2137  ;;  %2141 = vpow2.f32 %v1877_v45  ;;  %v1051_v20 = vpop.xlane.xlu1 %1050 }
 0x231   : > { %v1422_v27 = vadd.f32 %v1406_v6, %v1390_v44  ;;  %v1275_v34 = vmul.f32 %v2134_v29, %v1274_v30  ;;  %v1210_v0 = vsel %vm2903_vm11, %v1209_v32, %v1205_v50  ;;  %v2937_v17 = vadd.f32 1.0, %v2138_v19 }
 0x232   : > { %v1418_v60 = vadd.f32 %v1402_v49, %v1386_v51  ;;  %v1398_v14 = vmul.f32 %v1210_v0, %v2789_v53  ;;  %v1154_v11 = vsub.f32 1.0, %v1153_v57  ;;  %vm1158_vm4 = vweird.f32 %v2136_v62  ;;  %v1055_v49 = vpop.xlane.xlu0 %1054 }
 0x233   : > { %1438 = vst [vmem:[#allocation3 + $0x60] sm:$0xff] %v1422_v27  ;;  %v1276_v8 = vadd.f32 %v2134_v29, %v1275_v34  ;;  %v1882_v59 = vmul.f32 -1.442695, %v1064_v9  ;;  %v1063_v1 = vadd.f32 %v2850_v56, %v1037_v52  ;;  %2143 = vrcp.f32 %v2937_v17  ;;  %v2140_v16 = vpop.eup %2139  ;;  %v1047_v9 = vpop.xlane.xlu2 %1046 }
 0x234   : > { %1434 = vst [vmem:[#allocation3 + $0x40] sm:$0xff] %v1418_v60  ;;  %v1414_v23 = vadd.f32 %v1398_v14, %v1382_v28  ;;  %v1155_v12 = vmul.f32 %v2136_v62, %v1154_v11  ;;  %vm1157_vm5 = vweird.f32 %v2900_v18  ;;  %v1060_v40 = vadd.f32 %v2850_v56, %v1031_v15 }
 0x235   : > { %v1280_v24 = vsel %vm1279_vm3, %v2134_v29, %v1276_v8  ;;  %v1070_v39 = vadd.f32 %v2850_v56, %v1051_v20  ;;  %v2951_v3 = vadd.f32 1.0, %v2140_v16  ;;  %2145 = vpow2.f32 %v1882_v59  ;;  %vm1159_vm6 = vmor %vm1157_vm5, %vm1158_vm4 }
 0x236   : > { %v1285_v32 = vsel %vm2918_vm0, %v1284_v54, %v1280_v24  ;;  %1430 = vst [vmem:[#allocation3 + $0x50] sm:$0xff] %v1414_v23  ;;  %v1156_v13 = vadd.f32 %v2136_v62, %v1155_v12  ;;  %v2142_v29 = vpop.eup %2141  ;;  %vm1162_vm7 = vcmp.eq.f32.partialorder %v1161_v63, 8.507059e+37  ;;  %v1164_v43 = vor.u32 1.1754944e-38, %v1163_v36 }
 0x237   : > { %v1403_v46 = vmul.f32 %v1285_v32, %v2803_v33  ;;  %v1881_v47 = vmul.f32 -1.442695, %v1063_v1  ;;  %v1296_v18 = vand.u32 2147483647, %v2937_v17  ;;  %2147 = vrcp.f32 %v2951_v3 }
 0x238   : > { %v1160_v35 = vsel %vm1159_vm6, %v2136_v62, %v1156_v13  ;;  %v2956_v6 = vadd.f32 1.0, %v2142_v29  ;;  %v1878_v51 = vmul.f32 -1.442695, %v1060_v40  ;;  %v1888_v30 = vmul.f32 -1.442695, %v1070_v39 }
 0x239   : > { %v1419_v44 = vadd.f32 %v1403_v46, %v1387_v42  ;;  %v1165_v54 = vsel %vm1162_vm7, %v1164_v43, %v1160_v35  ;;  %v2144_v25 = vpop.eup %2143  ;;  %2149 = vpow2.f32 %v1881_v47  ;;  %v1298_v62 = vand.u32 2147483648, %v2937_v17  ;;  %v1388_v43 = vld [vmem:[#allocation3 + $0x10] sm:$0xff]  ;;  %v1385_v47 = vld [vmem:[#allocation3 + $0x48] sm:$0xff] }
 0x23a   : > { %v1395_v10 = vmul.f32 %v1165_v54, %v2801_v4  ;;  %v1288_v45 = vmul.f32 %v2144_v25, %v2937_v17  ;;  %vm1292_vm8 = vweird.f32 %v2937_v17  ;;  %vm2962_vm9 = vcmp.eq.f32.partialorder %v1296_v18, 8.507059e+37 }
 0x23b   : > { %1435 = vst [vmem:[#allocation3 + $0x20] sm:$0xff] %v1419_v44  ;;  %v2146_v27 = vpop.eup %2145  ;;  %2151 = vrcp.f32 %v2956_v6  ;;  %v1072_v19 = vadd.f32 %v2850_v56, %v1055_v49  ;;  %v1221_v28 = vand.u32 2147483647, %v2951_v3  ;;  %v1223_v0 = vand.u32 2147483648, %v2951_v3 }
 0x23c   : > { %v1411_v50 = vadd.f32 %v1395_v10, %v1379_v48  ;;  %v1289_v57 = vsub.f32 1.0, %v1288_v45  ;;  %v2967_v52 = vadd.f32 1.0, %v2146_v27  ;;  %2153 = vpow2.f32 %v1878_v51 }
 0x23d   : > { %v2148_v60 = vpop.eup %2147  ;;  %2155 = vpow2.f32 %v1888_v30  ;;  %v1068_v63 = vadd.f32 %v2850_v56, %v1047_v9  ;;  %vm1293_vm10 = vweird.f32 %v2144_v25  ;;  %v1299_v14 = vor.u32 1.1754944e-38, %v1298_v62  ;;  %v1383_v62 = vld [vmem:[#allocation3 + $0x68] sm:$0xff] }
 0x23e   : > { %1427 = vst [vmem:[#allocation3] sm:$0xff] %v1411_v50  ;;  %v1290_v15 = vmul.f32 %v2144_v25, %v1289_v57  ;;  %v1213_v8 = vmul.f32 %v2148_v60, %v2951_v3  ;;  %vm1217_vm11 = vweird.f32 %v2951_v3  ;;  %v1176_v20 = vand.u32 2147483647, %v2956_v6  ;;  %vm1294_vm12 = vmor %vm1292_vm8, %vm1293_vm10 }
 0x23f   : > { %v2150_v11 = vpop.eup %2149  ;;  %v1178_v36 = vand.u32 2147483648, %v2956_v6  ;;  %2157 = vrcp.f32 %v2967_v52  ;;  %v1890_v24 = vmul.f32 -1.442695, %v1072_v19  ;;  %vm2982_vm13 = vcmp.eq.f32.partialorder %v1221_v28, 8.507059e+37  ;;  %v1053_v19 = vpop.xlane.xlu2 %1052 }
 0x240   : > { %v1291_v59 = vadd.f32 %v2144_v25, %v1290_v15  ;;  %v1214_v1 = vsub.f32 1.0, %v1213_v8  ;;  %v2978_v23 = vadd.f32 1.0, %v2150_v11  ;;  %v1224_v42 = vor.u32 1.1754944e-38, %v1223_v0 }
 0x241   : > { %v2152_v12 = vpop.eup %2151  ;;  %vm1172_vm14 = vweird.f32 %v2956_v6  ;;  %v1886_v32 = vmul.f32 -1.442695, %v1068_v63  ;;  %vm1218_vm15 = vweird.f32 %v2148_v60  ;;  %vm2990_vm0 = vcmp.eq.f32.partialorder %v1176_v20, 8.507059e+37 }
 0x242   : > { %v2154_v40 = vpop.eup %2153  ;;  %v1295_v39 = vsel %vm1294_vm12, %v2144_v25, %v1291_v59  ;;  %v1215_v46 = vmul.f32 %v2148_v60, %v1214_v1  ;;  %v1168_v13 = vmul.f32 %v2152_v12, %v2956_v6  ;;  %v1179_v44 = vor.u32 1.1754944e-38, %v1178_v36  ;;  %vm1219_vm1 = vmor %vm1217_vm11, %vm1218_vm15  ;;  %v1380_v36 = vld [vmem:[#allocation3 + $0x58] sm:$0xff] }
 0x243   : > { %v2156_v29 = vpop.eup %2155  ;;  %v1300_v17 = vsel %vm2962_vm9, %v1299_v14, %v1295_v39  ;;  %2159 = vrcp.f32 %v2978_v23  ;;  %vm1173_vm2 = vweird.f32 %v2152_v12  ;;  %v2998_v51 = vadd.f32 1.0, %v2154_v40 }
 0x244   : > { %v1404_v35 = vmul.f32 %v1300_v17, %v2813_v61  ;;  %v1216_v18 = vadd.f32 %v2148_v60, %v1215_v46  ;;  %v1169_v48 = vsub.f32 1.0, %v1168_v13  ;;  %2161 = vpow2.f32 %v1890_v24  ;;  %vm1174_vm4 = vmor %vm1172_vm14, %vm1173_vm2 }
 0x245   : > { %v2158_v54 = vpop.eup %2157  ;;  %v3000_v25 = vadd.f32 1.0, %v2156_v29  ;;  %2163 = vpow2.f32 %v1886_v32  ;;  %v1251_v27 = vand.u32 2147483647, %v2967_v52  ;;  %v1253_v3 = vand.u32 2147483648, %v2967_v52 }
 0x246   : > { %v1420_v10 = vadd.f32 %v1404_v35, %v1388_v43  ;;  %v1220_v30 = vsel %vm1219_vm1, %v2148_v60, %v1216_v18  ;;  %v1170_v49 = vmul.f32 %v2152_v12, %v1169_v48  ;;  %v1243_v45 = vmul.f32 %v2158_v54, %v2967_v52 }
 0x247   : > { %v1225_v9 = vsel %vm2982_vm13, %v1224_v42, %v1220_v30  ;;  %2165 = vrcp.f32 %v2998_v51  ;;  %vm1247_vm3 = vweird.f32 %v2967_v52  ;;  %vm1248_vm5 = vweird.f32 %v2158_v54 }
 0x248   : > { %1436 = vst [vmem:[#allocation3 + $0x10] sm:$0xff] %v1420_v10  ;;  %v1399_v50 = vmul.f32 %v1225_v9, %v2809_v7  ;;  %v1171_v34 = vadd.f32 %v2152_v12, %v1170_v49  ;;  %v1244_v57 = vsub.f32 1.0, %v1243_v45  ;;  %v1236_v28 = vand.u32 2147483647, %v2978_v23  ;;  %vm1249_vm8 = vmor %vm1247_vm3, %vm1248_vm5 }
 0x249   : > { %v2160_v60 = vpop.eup %2159  ;;  %v1238_v0 = vand.u32 2147483648, %v2978_v23  ;;  %2167 = vrcp.f32 %v3000_v25  ;;  %vm3019_vm6 = vcmp.eq.f32.partialorder %v1251_v27, 8.507059e+37  ;;  %v1254_v1 = vor.u32 1.1754944e-38, %v1253_v3  ;;  %v1384_v3 = vld [vmem:[#allocation3 + $0x8] sm:$0xff] }
 0x24a   : > { %v2162_v63 = vpop.eup %2161  ;;  %v1415_v15 = vadd.f32 %v1399_v50, %v1383_v62  ;;  %v1175_v14 = vsel %vm1174_vm4, %v2152_v12, %v1171_v34  ;;  %v1245_v8 = vmul.f32 %v2158_v54, %v1244_v57  ;;  %v1228_v11 = vmul.f32 %v2160_v60, %v2978_v23 }
 0x24b   : > { %v2164_v20 = vpop.eup %2163  ;;  %v1180_v59 = vsel %vm2990_vm0, %v1179_v44, %v1175_v14  ;;  %v1071_v24 = vadd.f32 %v2850_v56, %v1053_v19  ;;  %vm1232_vm7 = vweird.f32 %v2978_v23  ;;  %vm1233_vm9 = vweird.f32 %v2160_v60 }
 0x24c   : > { %1431 = vst [vmem:[#allocation3 + $0x68] sm:$0xff] %v1415_v15  ;;  %v1396_v16 = vmul.f32 %v1180_v59, %v2811_v22  ;;  %v1246_v42 = vadd.f32 %v2158_v54, %v1245_v8  ;;  %v1229_v12 = vsub.f32 1.0, %v1228_v11  ;;  %vm3029_vm10 = vcmp.eq.f32.partialorder %v1236_v28, 8.507059e+37  ;;  %vm1234_vm12 = vmor %vm1232_vm7, %vm1233_vm9  ;;  %v1381_v8 = vld [vmem:[#allocation3 + $0x18] sm:$0xff] }
 0x24d   : > { %v2166_v32 = vpop.eup %2165  ;;  %v1239_v39 = vor.u32 1.1754944e-38, %v1238_v0  ;;  %v3033_v46 = vadd.f32 1.0, %v2162_v63  ;;  %vm1187_vm11 = vweird.f32 %v2998_v51  ;;  %v1191_v52 = vand.u32 2147483647, %v2998_v51 }
 0x24e   : > { %v1412_v56 = vadd.f32 %v1396_v16, %v1380_v36  ;;  %v1250_v13 = vsel %vm1249_vm8, %v2158_v54, %v1246_v42  ;;  %v1230_v29 = vmul.f32 %v2160_v60, %v1229_v12  ;;  %v1183_v43 = vmul.f32 %v2166_v32, %v2998_v51 }
 0x24f   : > { %v2168_v17 = vpop.eup %2167  ;;  %v1255_v44 = vsel %vm3019_vm6, %v1254_v1, %v1250_v13  ;;  %v3040_v35 = vadd.f32 1.0, %v2164_v20  ;;  %vm1188_vm13 = vweird.f32 %v2166_v32  ;;  %v1193_v30 = vand.u32 2147483648, %v2998_v51  ;;  %v1391_v1 = vld [vmem:[#allocation3 + $0x70] sm:$0xff] }
 0x250   : > { %1428 = vst [vmem:[#allocation3 + $0x58] sm:$0xff] %v1412_v56  ;;  %v1401_v18 = vmul.f32 %v1255_v44, %v2823_v38  ;;  %v1231_v48 = vadd.f32 %v2160_v60, %v1230_v29  ;;  %v1184_v10 = vsub.f32 1.0, %v1183_v43  ;;  %v1333_v54 = vmul.f32 %v2168_v17, %v3000_v25  ;;  %vm1189_vm15 = vmor %vm1187_vm11, %vm1188_vm13 }
 0x251   : > { %2169 = vrcp.f32 %v3033_v46  ;;  %v1889_v49 = vmul.f32 -1.442695, %v1071_v24  ;;  %v1341_v34 = vand.u32 2147483647, %v3000_v25  ;;  %v1343_v57 = vand.u32 2147483648, %v3000_v25 }
 0x252   : > { %v1417_v45 = vadd.f32 %v1401_v18, %v1385_v47  ;;  %v1235_v62 = vsel %vm1234_vm12, %v2160_v60, %v1231_v48  ;;  %v1185_v9 = vmul.f32 %v2166_v32, %v1184_v10  ;;  %v1334_v27 = vsub.f32 1.0, %v1333_v54  ;;  %v1393_v54 = vld [vmem:[#allocation3 + $0x28] sm:$0xff] }
 0x253   : > { %v1240_v50 = vsel %vm3029_vm10, %v1239_v39, %v1235_v62  ;;  %2171 = vrcp.f32 %v3040_v35  ;;  %vm1338_vm14 = vweird.f32 %v2168_v17  ;;  %v1194_v60 = vor.u32 1.1754944e-38, %v1193_v30  ;;  %v1389_v62 = vld [vmem:[#allocation3 + $0x38] sm:$0xff] }
 0x254   : > { %1433 = vst [vmem:[#allocation3 + $0x48] sm:$0xff] %v1417_v45  ;;  %v1400_v23 = vmul.f32 %v1240_v50, %v2825_v26  ;;  %v1186_v19 = vadd.f32 %v2166_v32, %v1185_v9  ;;  %v1335_v28 = vmul.f32 %v2168_v17, %v1334_v27  ;;  %vm1337_vm0 = vweird.f32 %v3000_v25 }
 0x255   : > { %2173 = vpow2.f32 %v1889_v49  ;;  %vm1192_vm1 = vcmp.eq.f32.partialorder %v1191_v52, 8.507059e+37  ;;  %vm1339_vm2 = vmor %vm1337_vm0, %vm1338_vm14  ;;  %v1344_v20 = vor.u32 1.1754944e-38, %v1343_v57  ;;  %vm1342_vm3 = vcmp.eq.f32.partialorder %v1341_v34, 8.507059e+37 }
 0x256   : > { %v1416_v0 = vadd.f32 %v1400_v23, %v1384_v3  ;;  %v1190_v63 = vsel %vm1189_vm15, %v2166_v32, %v1186_v19  ;;  %v1336_v15 = vadd.f32 %v2168_v17, %v1335_v28  ;;  %v1371_v40 = vand.u32 2147483647, %v3033_v46 }
 0x257   : > { %v2170_v14 = vpop.eup %2169  ;;  %v1195_v11 = vsel %vm1192_vm1, %v1194_v60, %v1190_v63  ;;  %v1373_v39 = vand.u32 2147483648, %v3033_v46  ;;  %vm1367_vm5 = vweird.f32 %v3033_v46  ;;  %v1313_v47 = vand.u32 2147483648, %v3040_v35 }
 0x258   : > { %1432 = vst [vmem:[#allocation3 + $0x8] sm:$0xff] %v1416_v0  ;;  %v1397_v36 = vmul.f32 %v1195_v11, %v2821_v21  ;;  %v1340_v59 = vsel %vm1339_vm2, %v2168_v17, %v1336_v15  ;;  %v1363_v51 = vmul.f32 %v2170_v14, %v3033_v46  ;;  %vm1368_vm4 = vweird.f32 %v2170_v14  ;;  %v1392_v15 = vld [vmem:[#allocation3 + $0x78] sm:$0xff] }
 0x259   : > { %v2172_v6 = vpop.eup %2171  ;;  %v1345_v25 = vsel %vm1342_vm3, %v1344_v20, %v1340_v59  ;;  %v1311_v17 = vand.u32 2147483647, %v3040_v35  ;;  %vm1369_vm7 = vmor %vm1367_vm5, %vm1368_vm4  ;;  %v1374_v18 = vor.u32 1.1754944e-38, %v1373_v39  ;;  %vm1372_vm8 = vcmp.eq.f32.partialorder %v1371_v40, 8.507059e+37 }
 0x25a   : > { %v1413_v24 = vadd.f32 %v1397_v36, %v1381_v8  ;;  %v1407_v16 = vmul.f32 %v1345_v25, %v2833_v55  ;;  %v1364_v42 = vsub.f32 1.0, %v1363_v51  ;;  %v1303_v12 = vmul.f32 %v2172_v6, %v3040_v35 }
 0x25b   : > { %v2174_v32 = vpop.eup %2173  ;;  %vm1308_vm6 = vweird.f32 %v2172_v6  ;;  %vm1307_vm9 = vweird.f32 %v3040_v35  ;;  %v1314_v46 = vor.u32 1.1754944e-38, %v1313_v47  ;;  %vm1312_vm11 = vcmp.eq.f32.partialorder %v1311_v17, 8.507059e+37 }
 0x25c   : > { %1429 = vst [vmem:[#allocation3 + $0x18] sm:$0xff] %v1413_v24  ;;  %v1423_v56 = vadd.f32 %v1407_v16, %v1391_v1  ;;  %v1365_v13 = vmul.f32 %v2170_v14, %v1364_v42  ;;  %v1304_v29 = vsub.f32 1.0, %v1303_v12  ;;  %v1135_v43 = vadd.f32 1.0, %v2174_v32  ;;  %vm1309_vm10 = vmor %vm1307_vm9, %vm1308_vm6 }
 0x25e   : > { %1439 = vst [vmem:[#allocation3 + $0x70] sm:$0xff] %v1423_v56  ;;  %v1366_v44 = vadd.f32 %v2170_v14, %v1365_v13  ;;  %v1305_v52 = vmul.f32 %v2172_v6, %v1304_v29  ;;  %2175 = vrcp.f32 %v1135_v43  ;;  %v1358_v35 = vand.u32 2147483648, %v1135_v43 }
 0x25f   : > { %v1356_v28 = vand.u32 2147483647, %v1135_v43  ;;  %vm1352_vm13 = vweird.f32 %v1135_v43 }
 0x260   : > { %v1370_v48 = vsel %vm1369_vm7, %v2170_v14, %v1366_v44  ;;  %v1306_v10 = vadd.f32 %v2172_v6, %v1305_v52  ;;  %v1359_v0 = vor.u32 1.1754944e-38, %v1358_v35 }
 0x261   : > { %v1375_v30 = vsel %vm1372_vm8, %v1374_v18, %v1370_v48  ;;  %vm1357_vm15 = vcmp.eq.f32.partialorder %v1356_v28, 8.507059e+37 }
 0x262   : > { %v1409_v49 = vmul.f32 %v1375_v30, %v2837_v41  ;;  %v1310_v45 = vsel %vm1309_vm10, %v2172_v6, %v1306_v10 }
 0x263   : > { %v1315_v9 = vsel %vm1312_vm11, %v1314_v46, %v1310_v45 }
 0x264   : > { %v2176_v27 = vpop.eup %2175  ;;  %v1425_v3 = vadd.f32 %v1409_v49, %v1393_v54  ;;  %v1405_v50 = vmul.f32 %v1315_v9, %v2835_v31 }
 0x265   : > { %v1348_v34 = vmul.f32 %v2176_v27, %v1135_v43  ;;  %vm1353_vm12 = vweird.f32 %v2176_v27 }
 0x266   : > { %1441 = vst [vmem:[#allocation3 + $0x28] sm:$0xff] %v1425_v3  ;;  %v1421_v57 = vadd.f32 %v1405_v50, %v1389_v62  ;;  %vm1354_vm14 = vmor %vm1352_vm13, %vm1353_vm12 }
 0x267   : > { %v1349_v23 = vsub.f32 1.0, %v1348_v34 }
 0x268   : > { %1437 = vst [vmem:[#allocation3 + $0x38] sm:$0xff] %v1421_v57 }
 0x269   : > { %v1350_v19 = vmul.f32 %v2176_v27, %v1349_v23 }
 0x26b   : > { %v1351_v60 = vadd.f32 %v2176_v27, %v1350_v19 }
 0x26d   : > { %v1355_v63 = vsel %vm1354_vm14, %v2176_v27, %v1351_v60 }
 0x26e   : > { %v1360_v14 = vsel %vm1357_vm15, %v1359_v0, %v1355_v63 }
 0x26f   : > { %v1408_v8 = vmul.f32 %v1360_v14, %v2845_v37  ;;  %1445 = sbr.rel (%p1891_p7) target bundleno = 638 (0x27e), region = 67 }
 0x271   : > { %v1424_v11 = vadd.f32 %v1408_v8, %v1392_v15 }
 0x273   : > { %1440 = vst [vmem:[#allocation3 + $0x78] sm:$0xff] %v1424_v11 }
 0x274   : > { %v1946_v20 = vpack.c.bf16 %v2801_v4, %v2785_v2  ;;  %v1951_v36 = vpack.c.bf16 %v2821_v21, %v2811_v22  ;;  %v1956_v59 = vpack.c.bf16 %v2809_v7, %v2789_v53  ;;  %v1961_v51 = vpack.c.bf16 %v2823_v38, %v2825_v26 }
 0x275   : > { %v1966_v6 = vpack.c.bf16 %v2803_v33, %v2791_v58  ;;  %v1971_v1 = vpack.c.bf16 %v2835_v31, %v2813_v61  ;;  %v1976_v2 = vpack.c.bf16 %v2833_v55, %v2793_v5  ;;  %v1981_v53 = vpack.c.bf16 %v2837_v41, %v2845_v37 }
 0x276   : > { %1947 = vst [vmem:[%s1467_s7] sm:$0xff] %v1946_v20  }
 0x277   : > { %1990 = vst [vmem:[%s1467_s7 + $0x8] sm:$0xff] %v1951_v36  }
 0x278   : > { %1991 = vst [vmem:[%s1467_s7 + $0x10] sm:$0xff] %v1956_v59  }
 0x279   : > { %1992 = vst [vmem:[%s1467_s7 + $0x18] sm:$0xff] %v1961_v51  }
 0x27a   : > { %1993 = vst [vmem:[%s1467_s7 + $0x20] sm:$0xff] %v1966_v6  }
 0x27b   : > { %1994 = vst [vmem:[%s1467_s7 + $0x28] sm:$0xff] %v1971_v1  }
 0x27c   : > { %1995 = vst [vmem:[%s1467_s7 + $0x30] sm:$0xff] %v1976_v2  }
 0x27d   : > { %1996 = vst [vmem:[%s1467_s7 + $0x38] sm:$0xff] %v1981_v53  }
 0x27e PF: > { %p1894_p8 = scmp.ne.s32.totalorder %s2257_s20, 3 }
 0x280   : > { %1487 = sbr.rel (%p1894_p8) target bundleno = 950 (0x3b6), region = 71 }
 0x285   : > { %v1504_v58 = vlaneseq  ;;  %v3093_v4 = vld [vmem:[#allocation3 + $0x50] sm:$0xff]  ;;  %v1490_v7 = vld [vmem:[#allocation3 + $0x58] sm:$0xff]  ;;  %v1493_v38 = vld [vmem:[#allocation3 + $0x68] sm:$0xff] }
 0x286   : > { %v1488_v22 = vld [vmem:[#allocation3 + $0x30] sm:$0xff]  ;;  %v1491_v26 = vld [vmem:[#allocation3 + $0x18] sm:$0xff]  ;;  %v1489_v55 = vld [vmem:[#allocation3] sm:$0xff] }
 0x287   : > { %v3095_v33 = vand.u32 127, %v1504_v58  ;;  %v1496_v25 = vld [vmem:[#allocation3 + $0x40] sm:$0xff]  ;;  %v3111_v24 = vld [vmem:[#allocation3 + $0x48] sm:$0xff]  ;;  %v3120_v40 = vld [vmem:[#allocation3 + $0x38] sm:$0xff] }
 0x288   : > { %v1494_v16 = vld [vmem:[#allocation3 + $0x8] sm:$0xff]  ;;  %v3122_v39 = vld [vmem:[#allocation3 + $0x10] sm:$0xff]  ;;  %v3124_v56 = vld [vmem:[#allocation3 + $0x20] sm:$0xff] }
 0x289   : > { %vm1506_vm0 = vcmp.lt.s32.totalorder %v3095_v33, 8  ;;  %v3135_v17 = vld [vmem:[#allocation3 + $0x78] sm:$0xff]  ;;  %v3137_v47 = vld [vmem:[#allocation3 + $0x70] sm:$0xff]  ;;  %v3139_v44 = vld [vmem:[#allocation3 + $0x60] sm:$0xff] }
 0x28a   : > { %v1511_v5 = vsel %vm1506_vm0, %v3093_v4, -1e+30  ;;  %v1509_v61 = vsel %vm1506_vm0, %v1490_v7, -1e+30  ;;  %v1507_v21 = vsel %vm1506_vm0, %v1488_v22, -1e+30 }
 0x28b   : > { %1531 = vmax.xlane.f32.xlu2 %v1511_v5  ;;  %1527 = vmax.xlane.f32.xlu1 %v1509_v61  ;;  %v1512_v31 = vsel %vm1506_vm0, %v1493_v38, -1e+30  ;;  %v1510_v41 = vsel %vm1506_vm0, %v1491_v26, -1e+30  ;;  %v1508_v37 = vsel %vm1506_vm0, %v1489_v55, -1e+30 }
 0x28c   : > { %1523 = vmax.xlane.f32.xlu0 %v1507_v21  ;;  %v1515_v42 = vsel %vm1506_vm0, %v1496_v25, -1e+30  ;;  %v1514_v12 = vsel %vm1506_vm0, %v3111_v24, -1e+30  ;;  %v1513_v32 = vsel %vm1506_vm0, %v1494_v16, -1e+30 }
 0x28d   : > { %v1518_v13 = vsel %vm1506_vm0, %v3120_v40, -1e+30  ;;  %v1517_v29 = vsel %vm1506_vm0, %v3122_v39, -1e+30  ;;  %v1516_v43 = vsel %vm1506_vm0, %v3124_v56, -1e+30 }
 0x28e   : > { %v1521_v52 = vsel %vm1506_vm0, %v3135_v17, -1e+30  ;;  %v1520_v18 = vsel %vm1506_vm0, %v3137_v47, -1e+30  ;;  %v1519_v48 = vsel %vm1506_vm0, %v3139_v44, -1e+30 }
 0x28f   : > { %v3150_v10 = vld [vmem:[#allocation3 + $0x28] sm:$0xff] }
 0x290   : > { %v1522_v54 = vsel %vm1506_vm0, %v3150_v10, -1e+30 }
 0x293   : > { %1533 = vmax.xlane.f32.xlu2 %v1512_v31  ;;  %1529 = vmax.xlane.f32.xlu1 %v1510_v41 }
 0x294   : > { %1525 = vmax.xlane.f32.xlu0 %v1508_v37 }
 0x29b   : > { %1539 = vmax.xlane.f32.xlu2 %v1515_v42  ;;  %1537 = vmax.xlane.f32.xlu1 %v1514_v12 }
 0x29c   : > { %1535 = vmax.xlane.f32.xlu0 %v1513_v32 }
 0x2a3   : > { %1545 = vmax.xlane.f32.xlu2 %v1518_v13  ;;  %1543 = vmax.xlane.f32.xlu1 %v1517_v29 }
 0x2a4   : > { %1541 = vmax.xlane.f32.xlu0 %v1516_v43 }
 0x2ab   : > { %1551 = vmax.xlane.f32.xlu2 %v1521_v52  ;;  %1549 = vmax.xlane.f32.xlu1 %v1520_v18 }
 0x2ac   : > { %1547 = vmax.xlane.f32.xlu0 %v1519_v48 }
 0x2b4   : > { %1553 = vmax.xlane.f32.xlu0 %v1522_v54 }
 0x2fe   : > { %v1532_v30 = vpop.xlane.xlu2 %1531  ;;  %v1528_v46 = vpop.xlane.xlu1 %1527 }
 0x2ff   : > { %v3155_v49 = vsub.f32 %v1490_v7, %v1528_v46  ;;  %v1524_v45 = vpop.xlane.xlu0 %1523  ;;  %v3170_v0 = vsub.f32 %v3093_v4, %v1532_v30 }
 0x300   : > { %v3157_v62 = vsub.f32 %v1488_v22, %v1524_v45 }
 0x301   : > { %v1575_v9 = vmul.f32 1.442695, %v3155_v49  ;;  %v1579_v11 = vmul.f32 1.442695, %v3170_v0 }
 0x302   : > { %v1571_v27 = vmul.f32 1.442695, %v3157_v62 }
 0x303   : > { %2177 = vpow2.f32 %v1575_v9 }
 0x304   : > { %2179 = vpow2.f32 %v1571_v27 }
 0x306   : > { %v1534_v3 = vpop.xlane.xlu2 %1533  ;;  %v1530_v50 = vpop.xlane.xlu1 %1529 }
 0x307   : > { %v3161_v34 = vsub.f32 %v1493_v38, %v1534_v3  ;;  %v3163_v57 = vsub.f32 %v1491_v26, %v1530_v50  ;;  %v1526_v23 = vpop.xlane.xlu0 %1525 }
 0x308   : > { %v3165_v35 = vsub.f32 %v1489_v55, %v1526_v23 }
 0x309   : > { %v1581_v19 = vmul.f32 1.442695, %v3161_v34  ;;  %v1577_v28 = vmul.f32 1.442695, %v3163_v57  ;;  %v2178_v60 = vpop.eup %2177 }
 0x30a   : > { %v1573_v63 = vmul.f32 1.442695, %v3165_v35  ;;  %v2180_v15 = vpop.eup %2179  ;;  %v1605_v14 = vsel %vm1506_vm0, %v2178_v60, 0.0 }
 0x30b   : > { %2181 = vpow2.f32 %v1581_v19  ;;  %1623 = vadd.xlane.f32.xlu0 %v1605_v14  ;;  %v1603_v8 = vsel %vm1506_vm0, %v2180_v15, 0.0 }
 0x30c   : > { %2183 = vpow2.f32 %v1577_v28  ;;  %1619 = vadd.xlane.f32.xlu1 %v1603_v8 }
 0x30d   : > { %2185 = vpow2.f32 %v1573_v63 }
 0x30e   : > { %v1540_v20 = vpop.xlane.xlu2 %1539  ;;  %v1538_v36 = vpop.xlane.xlu1 %1537  ;;  %2187 = vpow2.f32 %v1579_v11 }
 0x30f   : > { %v3178_v59 = vsub.f32 %v1496_v25, %v1540_v20  ;;  %v1536_v51 = vpop.xlane.xlu0 %1535  ;;  %v3184_v53 = vsub.f32 %v3111_v24, %v1538_v36 }
 0x310   : > { %v3180_v6 = vsub.f32 %v1494_v16, %v1536_v51 }
 0x311   : > { %v2182_v1 = vpop.eup %2181  ;;  %v1587_v2 = vmul.f32 1.442695, %v3178_v59  ;;  %v1585_v21 = vmul.f32 1.442695, %v3184_v53 }
 0x312   : > { %v2184_v58 = vpop.eup %2183  ;;  %v1583_v4 = vmul.f32 1.442695, %v3180_v6  ;;  %v1608_v7 = vsel %vm1506_vm0, %v2182_v1, 0.0 }
 0x313   : > { %v2186_v22 = vpop.eup %2185  ;;  %2189 = vpow2.f32 %v1587_v2  ;;  %v1606_v5 = vsel %vm1506_vm0, %v2184_v58, 0.0  ;;  %1629 = vadd.xlane.f32.xlu0 %v1608_v7 }
 0x314   : > { %2191 = vpow2.f32 %v1583_v4  ;;  %v1604_v61 = vsel %vm1506_vm0, %v2186_v22, 0.0  ;;  %1625 = vadd.xlane.f32.xlu1 %v1606_v5  ;;  %v2188_v41 = vpop.eup %2187 }
 0x315   : > { %1621 = vadd.xlane.f32.xlu2 %v1604_v61  ;;  %2193 = vpow2.f32 %v1585_v21 }
 0x316   : > { %v1546_v38 = vpop.xlane.xlu2 %1545  ;;  %v1544_v26 = vpop.xlane.xlu1 %1543 }
 0x317   : > { %v3195_v55 = vsub.f32 %v3120_v40, %v1546_v38  ;;  %v1542_v31 = vpop.xlane.xlu0 %1541  ;;  %v3202_v16 = vsub.f32 %v3122_v39, %v1544_v26 }
 0x318   : > { %v3198_v37 = vsub.f32 %v3124_v56, %v1542_v31  ;;  %v1607_v56 = vsel %vm1506_vm0, %v2188_v41, 0.0 }
 0x319   : > { %v2190_v25 = vpop.eup %2189  ;;  %v1593_v24 = vmul.f32 1.442695, %v3195_v55  ;;  %v1591_v39 = vmul.f32 1.442695, %v3202_v16 }
 0x31a   : > { %v2192_v42 = vpop.eup %2191  ;;  %v1589_v12 = vmul.f32 1.442695, %v3198_v37  ;;  %v1611_v32 = vsel %vm1506_vm0, %v2190_v25, 0.0 }
 0x31b   : > { %2195 = vpow2.f32 %v1593_v24  ;;  %v1609_v40 = vsel %vm1506_vm0, %v2192_v42, 0.0  ;;  %1635 = vadd.xlane.f32.xlu0 %v1611_v32  ;;  %v2194_v43 = vpop.eup %2193 }
 0x31c   : > { %2197 = vpow2.f32 %v1589_v12  ;;  %1631 = vadd.xlane.f32.xlu1 %v1609_v40 }
 0x31d   : > { %1627 = vadd.xlane.f32.xlu2 %v1607_v56  ;;  %2199 = vpow2.f32 %v1591_v39 }
 0x31e   : > { %v1552_v13 = vpop.xlane.xlu2 %1551  ;;  %v1550_v29 = vpop.xlane.xlu1 %1549 }
 0x31f   : > { %v3213_v52 = vsub.f32 %v3135_v17, %v1552_v13  ;;  %v1548_v18 = vpop.xlane.xlu0 %1547  ;;  %v3220_v46 = vsub.f32 %v3137_v47, %v1550_v29  ;;  %v1610_v17 = vsel %vm1506_vm0, %v2194_v43, 0.0 }
 0x320   : > { %v3216_v48 = vsub.f32 %v3139_v44, %v1548_v18 }
 0x321   : > { %v2196_v54 = vpop.eup %2195  ;;  %v1599_v30 = vmul.f32 1.442695, %v3213_v52  ;;  %v1597_v47 = vmul.f32 1.442695, %v3220_v46 }
 0x322   : > { %v2198_v45 = vpop.eup %2197  ;;  %v1595_v9 = vmul.f32 1.442695, %v3216_v48  ;;  %v1614_v27 = vsel %vm1506_vm0, %v2196_v54, 0.0 }
 0x323   : > { %2201 = vpow2.f32 %v1599_v30  ;;  %v1612_v44 = vsel %vm1506_vm0, %v2198_v45, 0.0  ;;  %1641 = vadd.xlane.f32.xlu0 %v1614_v27  ;;  %v2200_v3 = vpop.eup %2199 }
 0x324   : > { %2203 = vpow2.f32 %v1595_v9  ;;  %1637 = vadd.xlane.f32.xlu1 %v1612_v44  ;;  %v1613_v15 = vsel %vm1506_vm0, %v2200_v3, 0.0 }
 0x325   : > { %1633 = vadd.xlane.f32.xlu2 %v1610_v17  ;;  %2205 = vpow2.f32 %v1597_v47 }
 0x327   : > { %v1554_v50 = vpop.xlane.xlu0 %1553 }
 0x328   : > { %v3231_v23 = vsub.f32 %v3150_v10, %v1554_v50 }
 0x329   : > { %v2202_v19 = vpop.eup %2201 }
 0x32a   : > { %v2204_v28 = vpop.eup %2203  ;;  %v1601_v60 = vmul.f32 1.442695, %v3231_v23  ;;  %v1617_v63 = vsel %vm1506_vm0, %v2202_v19, 0.0 }
 0x32b   : > { %v1615_v14 = vsel %vm1506_vm0, %v2204_v28, 0.0  ;;  %1647 = vadd.xlane.f32.xlu0 %v1617_v63  ;;  %v2206_v10 = vpop.eup %2205 }
 0x32c   : > { %2207 = vpow2.f32 %v1601_v60  ;;  %1643 = vadd.xlane.f32.xlu1 %v1615_v14  ;;  %v1616_v11 = vsel %vm1506_vm0, %v2206_v10, 0.0 }
 0x32d   : > { %1639 = vadd.xlane.f32.xlu2 %v1613_v15 }
 0x332   : > { %v2208_v8 = vpop.eup %2207 }
 0x333   : > { %v1618_v20 = vsel %vm1506_vm0, %v2208_v8, 0.0 }
 0x334   : > { %1649 = vadd.xlane.f32.xlu1 %v1618_v20 }
 0x335   : > { %1645 = vadd.xlane.f32.xlu2 %v1616_v11 }
 0x37e   : > { %v1624_v36 = vpop.xlane.xlu0 %1623 }
 0x37f   : > { %v1620_v51 = vpop.xlane.xlu1 %1619  ;;  %2209 = vlog2.f32 %v1624_v36 }
 0x380   : > { %2211 = vlog2.f32 %v1620_v51 }
 0x385   : > { %v2210_v1 = vpop.eup %2209 }
 0x386   : > { %v2212_v2 = vpop.eup %2211  ;;  %v1656_v58 = vmul.f32 0.6931472, %v2210_v1  ;;  %v1630_v4 = vpop.xlane.xlu0 %1629 }
 0x387   : > { %v1652_v7 = vmul.f32 0.6931472, %v2212_v2  ;;  %v1626_v22 = vpop.xlane.xlu1 %1625  ;;  %2213 = vlog2.f32 %v1630_v4 }
 0x388   : > { %v1622_v5 = vpop.xlane.xlu2 %1621  ;;  %v1685_v61 = vsub.f32 %v3155_v49, %v1656_v58  ;;  %2215 = vlog2.f32 %v1626_v22 }
 0x389   : > { %v1683_v33 = vsub.f32 %v3157_v62, %v1652_v7  ;;  %2217 = vlog2.f32 %v1622_v5 }
 0x38a   : > { %1701 = vst [vmem:[%s3322_s5 + $0x10] sm:$0xff] %v1685_v61 }
 0x38b   : > { %1699 = vst [vmem:[%s3322_s5] sm:$0xff] %v1683_v33 }
 0x38d   : > { %v2214_v21 = vpop.eup %2213 }
 0x38e   : > { %v2216_v38 = vpop.eup %2215  ;;  %v1662_v26 = vmul.f32 0.6931472, %v2214_v21  ;;  %v1636_v31 = vpop.xlane.xlu0 %1635 }
 0x38f   : > { %v2218_v41 = vpop.eup %2217  ;;  %v1658_v25 = vmul.f32 0.6931472, %v2216_v38  ;;  %v1632_v49 = vpop.xlane.xlu1 %1631  ;;  %2219 = vlog2.f32 %v1636_v31 }
 0x390   : > { %v1628_v24 = vpop.xlane.xlu2 %1627  ;;  %v1654_v42 = vmul.f32 0.6931472, %v2218_v41  ;;  %v1688_v62 = vsub.f32 %v3161_v34, %v1662_v26 }
 0x391   : > { %2221 = vlog2.f32 %v1628_v24  ;;  %v1686_v12 = vsub.f32 %v3163_v57, %v1658_v25 }
 0x392   : > { %2223 = vlog2.f32 %v1632_v49  ;;  %v1684_v32 = vsub.f32 %v3165_v35, %v1654_v42  ;;  %1704 = vst [vmem:[%s3322_s5 + $0x28] sm:$0xff] %v1688_v62 }
 0x393   : > { %1702 = vst [vmem:[%s3322_s5 + $0x18] sm:$0xff] %v1686_v12 }
 0x394   : > { %1700 = vst [vmem:[%s3322_s5 + $0x8] sm:$0xff] %v1684_v32 }
 0x395   : > { %v2220_v40 = vpop.eup %2219 }
 0x396   : > { %v1668_v56 = vmul.f32 0.6931472, %v2220_v40  ;;  %v1642_v39 = vpop.xlane.xlu0 %1641 }
 0x397   : > { %v2222_v34 = vpop.eup %2221  ;;  %v1638_v35 = vpop.xlane.xlu1 %1637  ;;  %2225 = vlog2.f32 %v1642_v39 }
 0x398   : > { %v2224_v57 = vpop.eup %2223  ;;  %v1660_v13 = vmul.f32 0.6931472, %v2222_v34  ;;  %v1634_v29 = vpop.xlane.xlu2 %1633  ;;  %v1691_v18 = vsub.f32 %v3178_v59, %v1668_v56 }
 0x399   : > { %v1664_v43 = vmul.f32 0.6931472, %v2224_v57  ;;  %2227 = vlog2.f32 %v1634_v29 }
 0x39a   : > { %v1687_v54 = vsub.f32 %v3170_v0, %v1660_v13  ;;  %2229 = vlog2.f32 %v1638_v35  ;;  %1707 = vst [vmem:[%s3322_s5 + $0x40] sm:$0xff] %v1691_v18 }
 0x39b   : > { %v1689_v30 = vsub.f32 %v3180_v6, %v1664_v43 }
 0x39c   : > { %1703 = vst [vmem:[%s3322_s5 + $0x20] sm:$0xff] %v1687_v54 }
 0x39d   : > { %1705 = vst [vmem:[%s3322_s5 + $0x30] sm:$0xff] %v1689_v30  ;;  %v2226_v45 = vpop.eup %2225 }
 0x39e   : > { %v1674_v9 = vmul.f32 0.6931472, %v2226_v45  ;;  %v1648_v27 = vpop.xlane.xlu0 %1647 }
 0x39f   : > { %v2228_v59 = vpop.eup %2227  ;;  %v1644_v6 = vpop.xlane.xlu1 %1643  ;;  %2231 = vlog2.f32 %v1648_v27 }
 0x3a0   : > { %v2230_v0 = vpop.eup %2229  ;;  %v1666_v17 = vmul.f32 0.6931472, %v2228_v59  ;;  %v1640_v44 = vpop.xlane.xlu2 %1639  ;;  %v1694_v3 = vsub.f32 %v3195_v55, %v1674_v9 }
 0x3a1   : > { %v1670_v47 = vmul.f32 0.6931472, %v2230_v0  ;;  %2233 = vlog2.f32 %v1640_v44 }
 0x3a2   : > { %v1690_v50 = vsub.f32 %v3184_v53, %v1666_v17  ;;  %2235 = vlog2.f32 %v1644_v6  ;;  %1710 = vst [vmem:[%s3322_s5 + $0x58] sm:$0xff] %v1694_v3 }
 0x3a3   : > { %v1692_v19 = vsub.f32 %v3198_v37, %v1670_v47 }
 0x3a4   : > { %1706 = vst [vmem:[%s3322_s5 + $0x38] sm:$0xff] %v1690_v50 }
 0x3a5   : > { %1708 = vst [vmem:[%s3322_s5 + $0x48] sm:$0xff] %v1692_v19  ;;  %v2232_v28 = vpop.eup %2231 }
 0x3a6   : > { %v1680_v60 = vmul.f32 0.6931472, %v2232_v28 }
 0x3a7   : > { %v2234_v55 = vpop.eup %2233  ;;  %v1650_v14 = vpop.xlane.xlu1 %1649 }
 0x3a8   : > { %v2236_v63 = vpop.eup %2235  ;;  %v1672_v53 = vmul.f32 0.6931472, %v2234_v55  ;;  %v1646_v15 = vpop.xlane.xlu2 %1645  ;;  %v1697_v10 = vsub.f32 %v3213_v52, %v1680_v60 }
 0x3a9   : > { %v1676_v37 = vmul.f32 0.6931472, %v2236_v63  ;;  %2237 = vlog2.f32 %v1646_v15 }
 0x3aa   : > { %v1693_v8 = vsub.f32 %v3202_v16, %v1672_v53  ;;  %2239 = vlog2.f32 %v1650_v14  ;;  %1713 = vst [vmem:[%s3322_s5 + $0x70] sm:$0xff] %v1697_v10 }
 0x3ab   : > { %v1695_v11 = vsub.f32 %v3216_v48, %v1676_v37 }
 0x3ac   : > { %1709 = vst [vmem:[%s3322_s5 + $0x50] sm:$0xff] %v1693_v8 }
 0x3ad   : > { %1711 = vst [vmem:[%s3322_s5 + $0x60] sm:$0xff] %v1695_v11 }
 0x3af   : > { %v2238_v20 = vpop.eup %2237 }
 0x3b0   : > { %v2240_v52 = vpop.eup %2239  ;;  %v1678_v36 = vmul.f32 0.6931472, %v2238_v20 }
 0x3b1   : > { %v1682_v51 = vmul.f32 0.6931472, %v2240_v52 }
 0x3b2   : > { %v1696_v16 = vsub.f32 %v3220_v46, %v1678_v36 }
 0x3b3   : > { %v1698_v48 = vsub.f32 %v3231_v23, %v1682_v51 }
 0x3b4   : > { %1712 = vst [vmem:[%s3322_s5 + $0x68] sm:$0xff] %v1696_v16 }
 0x3b5   : > { %1714 = vst [vmem:[%s3322_s5 + $0x78] sm:$0xff] %v1698_v48 }
 0x3b6 PF: > { %s16_s22 = sadd.s32 1, %s2265_s22   ;;  %s3365_s20 = smov %s2261_s21 }
 0x3b7   : > { %p13_p9 = scmp.ge.s32.totalorder %s16_s22, 6   ;;  %s3366_s21 = smov %s3368_s4 }
 0x3b9   :  { %15 = sbr.rel (!%p13_p9) target bundleno = 2 (0x2), region = 113 }
 0x3be   :  { %1737 = vsyncmov [#allocation4] }
 0x3c1   :  { %s1738_s15 = vpop.sfrf %1737 }
 0x3c2   :  { %p1899_p10 = scmp.ne.s32.totalorder %s1738_s15, 0 }
 0x3c4   :  { %1742 = shalt.err (%p1899_p10)  }

</bundles_post_ra>
